<compile_context>
chip_gen: v7x
topology: tpu7x:2x2x1
jax: 0.10.0
libtpu: 0.0.40
codegen_flags: <defaults>
</compile_context>

<pallas_src>
import functools
import math

import jax
import jax.numpy as jnp
import numpy as np
from jax import lax
from jax.experimental import pallas as pl
from jax.experimental.pallas import tpu as pltpu


# ----------------------------------------------------------------------------
# RoPE tables
# ----------------------------------------------------------------------------
def rope_tables(t_len, k_channels, base=10000.0):
    """Per-head time-major cos/sin (T, Dh) + rotate-half matrix (Dh, Dh).

    Used only by the pure-JAX reference. Matches Matcha/GradTTS
    RotaryPositionalEmbeddings(d = k_channels * 0.5).
    """
    d = int(k_channels * 0.5)
    theta = 1.0 / (base ** (np.arange(0, d, 2, dtype=np.float32) / d))
    idx = np.arange(t_len, dtype=np.float32)
    ang = np.einsum("n,f->nf", idx, theta)
    ang2 = np.concatenate([ang, ang], axis=1)                       # (T, d)

    cos = np.ones((t_len, k_channels), np.float32)
    sin = np.zeros((t_len, k_channels), np.float32)
    cos[:, :d] = np.cos(ang2)
    sin[:, :d] = np.sin(ang2)

    rot = np.zeros((k_channels, k_channels), np.float32)
    half = d // 2
    for i in range(half):
        rot[i + half, i] = -1.0
        rot[i, i + half] = 1.0
    return cos, sin, rot


def rope_tables_cm(t_len, n_heads, k_channels, base=10000.0):
    """Channel-major (C, T) bf16 tables for the fused kernel.

    rope(z)[c, t] = z[c, t] * cos[c, t]
                  + z[(c + half) % C, t] * sin_neg[c, t]   (roll by C - half)
                  + z[(c - half) % C, t] * sin_pos[c, t]   (roll by half)
    with half = (k_channels // 2) // 2. Identical per-head tables tiled along
    the channel axis; entries outside the rotary span are cos=1, sin=0, so the
    circular rolls never contribute across head boundaries.
    """
    d = int(k_channels * 0.5)
    half = d // 2
    theta = 1.0 / (base ** (np.arange(0, d, 2, dtype=np.float32) / d))
    idx = np.arange(t_len, dtype=np.float32)
    ang = np.einsum("n,f->nf", idx, theta)                          # (T, d//2)
    ang2 = np.concatenate([ang, ang], axis=1).T                     # (d, T)

    cos_h = np.ones((k_channels, t_len), np.float32)
    sin_h = np.zeros((k_channels, t_len), np.float32)
    cos_h[:d] = np.cos(ang2)
    sin_h[:d] = np.sin(ang2)

    sin_neg = np.zeros_like(sin_h)
    sin_pos = np.zeros_like(sin_h)
    sin_neg[:half] = -sin_h[:half]          # first rotary half gets -x[c+half]
    sin_pos[half:d] = sin_h[half:d]         # second rotary half gets +x[c-half]

    tile = lambda a: np.tile(a, (n_heads, 1))                       # (C, T)
    return (jnp.asarray(tile(cos_h), jnp.bfloat16),
            jnp.asarray(tile(sin_neg), jnp.bfloat16),
            jnp.asarray(tile(sin_pos), jnp.bfloat16),
            half)


# ----------------------------------------------------------------------------
# Kernel 1: fused QKV projection (one matmul) + partial RoPE (sublane rolls)
# ----------------------------------------------------------------------------
def qkv_rope_kernel(x_ref, w_ref, b_ref, cos_ref, sinn_ref, sinp_ref,
                    q_ref, k_ref, v_ref, *, n_heads, k_channels, half):
    C = n_heads * k_channels
    x = x_ref[0].astype(jnp.bfloat16)                  # (C, tt), cast in-kernel

    # One fused 1x1-Conv matmul for Q|K|V: bf16 MXU inputs, f32 accumulation.
    qkv = jnp.dot(w_ref[...], x,
                  preferred_element_type=jnp.float32) + b_ref[...]   # (3C, tt)

    cos = cos_ref[...].astype(jnp.float32)             # bf16 in HBM, f32 math
    sinn = sinn_ref[...].astype(jnp.float32)
    sinp = sinp_ref[...].astype(jnp.float32)

    def rope(z):                                       # (C, tt) f32
        # Partial rotate-half via two static sublane rolls; sign and the
        # rotary/pass-through masking live in the precomputed sin tables.
        return (z * cos
                + jnp.roll(z, C - half, axis=0) * sinn
                + jnp.roll(z, half, axis=0) * sinp)

    q = rope(qkv[0:C])                                 # SDPA scale pre-folded
    k = rope(qkv[C:2 * C])
    v = qkv[2 * C:3 * C]

    # K/V stay channel-major (a head is an 8-aligned sublane block); Q goes
    # out head-major so kernel 2's per-head block is full-extent in lanes.
    for h in range(n_heads):                           # static unroll, H small
        q_ref[0, h] = jnp.transpose(
            q[h * k_channels:(h + 1) * k_channels, :]).astype(q_ref.dtype)
    k_ref[0] = k.astype(k_ref.dtype)
    v_ref[0] = v.astype(v_ref.dtype)


# ----------------------------------------------------------------------------
# Kernel 2: per-head flash attention + fused output projection
# ----------------------------------------------------------------------------
def flash_attn_kernel(q_ref, k_ref, v_ref, wo_ref, bo_ref, o_ref,
                      m_ref, l_ref, acc_ref, oacc_ref, *, n_heads):
    h = pl.program_id(2)
    ki = pl.program_id(3)
    n_kv = pl.num_programs(3)

    @pl.when(jnp.logical_and(h == 0, ki == 0))
    def _init_output():
        oacc_ref[...] = jnp.zeros(oacc_ref.shape, oacc_ref.dtype)

    @pl.when(ki == 0)
    def _init_head():
        m_ref[...] = jnp.full(m_ref.shape, -jnp.inf, dtype=m_ref.dtype)
        l_ref[...] = jnp.zeros(l_ref.shape, l_ref.dtype)
        acc_ref[...] = jnp.zeros(acc_ref.shape, acc_ref.dtype)

    q = q_ref[0, 0]            # (tq, Dh) bf16, 1/sqrt(Dh) folded into Wq
    kT = k_ref[0]              # (Dh, tk) bf16 (channel-major == pre-transposed)
    vT = v_ref[0]              # (Dh, tk) bf16

    s = jnp.dot(q, kT, preferred_element_type=jnp.float32)          # (tq, tk)

    m_prev = m_ref[...]                                              # (tq, 1)
    m_new = jnp.maximum(m_prev, jnp.max(s, axis=-1, keepdims=True))
    alpha = jnp.exp(m_prev - m_new)
    p = jnp.exp(s - m_new)                                           # f32
    l_ref[...] = alpha * l_ref[...] + jnp.sum(p, axis=-1, keepdims=True)
    acc_ref[...] = alpha * acc_ref[...] + lax.dot_general(
        p.astype(jnp.bfloat16), vT, (((1,), (1,)), ((), ())),
        preferred_element_type=jnp.float32)                          # (tq, Dh)
    m_ref[...] = m_new

    @pl.when(ki == n_kv - 1)
    def _accumulate_head_output():
        attn = (acc_ref[...] * pl.reciprocal(l_ref[...], approx=False)
                ).astype(jnp.bfloat16)                               # (tq, Dh)
        # Per-head slice of the output 1x1-Conv, emitted transposed (out_C, tq)
        # so the kernel writes the module's (B, out_C, T) layout directly.
        oacc_ref[...] += lax.dot_general(
            wo_ref[0], attn, (((1,), (1,)), ((), ())),
            preferred_element_type=jnp.float32)                     # (out_C, tq)

    @pl.when(jnp.logical_and(ki == n_kv - 1, h == n_heads - 1))
    def _store():
        o_ref[0] = (oacc_ref[...] + bo_ref[...]).astype(o_ref.dtype)


# ----------------------------------------------------------------------------
# Wrapper
# ----------------------------------------------------------------------------
_VMEM_LIMIT = 48 * 1024 * 1024   # headroom under v7x's 64 MiB physical VMEM


def _pick_tile(n, cap):
    """Largest tile <= cap dividing n that is lane-legal (multiple of 128);
    falls back to the full extent, which is always legal for BlockSpec."""
    if n <= cap:
        return n
    t = (cap // 128) * 128
    while t >= 128:
        if n % t == 0:
            return t
        t -= 128
    # TODO(synk): pad T to a multiple of 128 (with score masking) instead of
    # falling back to whole-T tiles for awkward sequence lengths.
    return n


def _kv_tile(t_len, tq, d_head, budget_bytes=16 * 1024 * 1024):
    """Whole-T K/V residency when it fits the VMEM budget, else a 128-multiple."""
    per_pos = 8 * d_head + 8 * tq   # dbl-buffered bf16 K+V + f32 s/p rows
    if t_len * per_pos <= budget_bytes:
        return t_len
    return _pick_tile(t_len, max(128, (budget_bytes // per_pos) // 128 * 128))


def multi_head_attention(x_bct, params, n_heads):
    """x_bct: (B, C, T) exactly as the PyTorch module; returns (B, out_C, T)."""
    B, C, T = x_bct.shape
    out_C = params["wo"].shape[0]
    assert C % n_heads == 0
    Dh = C // n_heads
    assert Dh % 8 == 0, "k_channels must be a multiple of 8 (sublane tiling)"

    # --- tiny parameter prep (folded under jit in real use) ------------------
    scale = 1.0 / math.sqrt(Dh)                # SDPA scale folded into Wq / bq
    wqkv = jnp.concatenate(
        [params["wq"] * scale, params["wk"], params["wv"]],
        axis=0).astype(jnp.bfloat16)                               # (3C, C)
    bqkv = jnp.concatenate(
        [params["bq"].reshape(-1) * scale,
         params["bk"].reshape(-1),
         params["bv"].reshape(-1)]).reshape(3 * C, 1).astype(jnp.float32)
    wo_h = jnp.transpose(
        params["wo"].reshape(out_C, n_heads, Dh), (1, 0, 2)
    ).astype(jnp.bfloat16)                                         # (H, out_C, Dh)
    bo = params["bo"].reshape(out_C, 1).astype(jnp.float32)

    cos_cm, sinn_cm, sinp_cm, half = rope_tables_cm(T, n_heads, Dh)

    tt = _pick_tile(T, 256)
    const2 = lambda shp: pl.BlockSpec(shp, lambda t, b: (0, 0))

    # ---- Kernel 1: fused QKV 1x1-conv + partial RoPE ------------------------
    # Grid is (time-tile, batch) with batch innermost so the t-indexed RoPE
    # tables are fetched once per time tile, not once per (tile, batch).
    q_hm, k_cm, v_cm = pl.pallas_call(
        functools.partial(qkv_rope_kernel, n_heads=n_heads, k_channels=Dh,
                          half=half),
        out_shape=(jax.ShapeDtypeStruct((B, n_heads, T, Dh), jnp.bfloat16),
                   jax.ShapeDtypeStruct((B, C, T), jnp.bfloat16),
                   jax.ShapeDtypeStruct((B, C, T), jnp.bfloat16)),
        grid=(T // tt, B),
        in_specs=[
            pl.BlockSpec((1, C, tt), lambda t, b: (b, 0, t)),   # x (module NCT)
            const2((3 * C, C)),                                 # fused Wq|Wk|Wv
            const2((3 * C, 1)),                                 # fused bias
            pl.BlockSpec((C, tt), lambda t, b: (0, t)),         # cos  (bf16)
            pl.BlockSpec((C, tt), lambda t, b: (0, t)),         # -sin (1st half)
            pl.BlockSpec((C, tt), lambda t, b: (0, t)),         # +sin (2nd half)
        ],
        out_specs=[
            pl.BlockSpec((1, n_heads, tt, Dh), lambda t, b: (b, 0, t, 0)),
            pl.BlockSpec((1, C, tt), lambda t, b: (b, 0, t)),
            pl.BlockSpec((1, C, tt), lambda t, b: (b, 0, t)),
        ],
        compiler_params=pltpu.CompilerParams(
            dimension_semantics=("parallel", "parallel"),
            vmem_limit_bytes=_VMEM_LIMIT),
    )(x_bct, wqkv, bqkv, cos_cm, sinn_cm, sinp_cm)

    # ---- Kernel 2: per-head flash attention + fused output 1x1-conv ---------
    tq = _pick_tile(T, 256)
    if B * (T // tq) < 2 and tq % 256 == 0:
        tq //= 2                    # keep >= 2 parallel steps for v7x's 2 TCs
    nq = T // tq
    tk = _kv_tile(T, tq, Dh)        # whole-T K/V residency when it fits VMEM
    nkv = T // tk

    out = pl.pallas_call(
        functools.partial(flash_attn_kernel, n_heads=n_heads),
        out_shape=jax.ShapeDtypeStruct((B, out_C, T), jnp.bfloat16),
        grid=(B, nq, n_heads, nkv),           # reduction axes (head, kv) last
        in_specs=[
            pl.BlockSpec((1, 1, tq, Dh), lambda b, qi, h, ki: (b, h, qi, 0)),
            pl.BlockSpec((1, Dh, tk), lambda b, qi, h, ki: (b, h, ki)),
            pl.BlockSpec((1, Dh, tk), lambda b, qi, h, ki: (b, h, ki)),
            pl.BlockSpec((1, out_C, Dh), lambda b, qi, h, ki: (h, 0, 0)),
            pl.BlockSpec((out_C, 1), lambda b, qi, h, ki: (0, 0)),
        ],
        out_specs=pl.BlockSpec((1, out_C, tq), lambda b, qi, h, ki: (b, 0, qi)),
        scratch_shapes=[
            pltpu.VMEM((tq, 1), jnp.float32),       # running max
            pltpu.VMEM((tq, 1), jnp.float32),       # running sum
            pltpu.VMEM((tq, Dh), jnp.float32),      # per-head value accumulator
            pltpu.VMEM((out_C, tq), jnp.float32),   # fused output accumulator
        ],
        compiler_params=pltpu.CompilerParams(
            dimension_semantics=("parallel", "parallel", "arbitrary", "arbitrary"),
            vmem_limit_bytes=_VMEM_LIMIT),
    )(q_hm, k_cm, v_cm, wo_h, bo)

    return out                                   # (B, out_C, T), bf16


# ----------------------------------------------------------------------------
# Pure-JAX f32 reference (correctness check)
# ----------------------------------------------------------------------------
def reference(x_bct, params, n_heads):
    B, C, T = x_bct.shape
    Dh = C // n_heads
    x = jnp.transpose(x_bct, (0, 2, 1))                          # (B, T, C)
    q = x @ params["wq"].T + params["bq"]
    k = x @ params["wk"].T + params["bk"]
    v = x @ params["wv"].T + params["bv"]

    def split_heads(a):  # (B, T, C) -> (B, H, T, Dh)
        return jnp.transpose(a.reshape(B, T, n_heads, Dh), (0, 2, 1, 3))

    q, k, v = split_heads(q), split_heads(k), split_heads(v)
    cos, sin, rot = rope_tables(T, Dh)
    q = q * cos + jnp.einsum("bhtd,de->bhte", q, jnp.asarray(rot)) * sin
    k = k * cos + jnp.einsum("bhtd,de->bhte", k, jnp.asarray(rot)) * sin

    s = jnp.einsum("bhqd,bhkd->bhqk", q, k) / math.sqrt(Dh)
    p = jax.nn.softmax(s, axis=-1)
    o = jnp.einsum("bhqk,bhkd->bhqd", p, v)                      # (B, H, T, Dh)
    o = jnp.transpose(o, (0, 2, 1, 3)).reshape(B, T, C)          # merge heads
    o = o @ params["wo"].T + params["bo"]
    return jnp.transpose(o, (0, 2, 1))                           # (B, out_C, T)


# ----------------------------------------------------------------------------
# Deterministic parameter init (shapes from the module's __init__)
# ----------------------------------------------------------------------------
def init_params(key, channels, out_channels):
    ks = jax.random.split(key, 8)
    xavier = math.sqrt(6.0 / (channels + channels))   # xavier_uniform q/k/v
    binit = 1.0 / math.sqrt(channels)                 # PyTorch conv bias bound
    return {
        "wq": jax.random.uniform(ks[0], (channels, channels), jnp.float32, -xavier, xavier),
        "bq": jax.random.uniform(ks[1], (1, channels), jnp.float32, -binit, binit),
        "wk": jax.random.uniform(ks[2], (channels, channels), jnp.float32, -xavier, xavier),
        "bk": jax.random.uniform(ks[3], (1, channels), jnp.float32, -binit, binit),
        "wv": jax.random.uniform(ks[4], (channels, channels), jnp.float32, -xavier, xavier),
        "bv": jax.random.uniform(ks[5], (1, channels), jnp.float32, -binit, binit),
        "wo": jax.random.uniform(ks[6], (out_channels, channels), jnp.float32, -binit, binit),
        "bo": jax.random.uniform(ks[7], (1, out_channels), jnp.float32, -binit, binit),
    }


if __name__ == "__main__":
    B, C, T = 2, 128, 128
    n_heads = 4
    out_channels = 64

    key = jax.random.PRNGKey(0)
    k_params, k_x = jax.random.split(key)
    params = init_params(k_params, C, out_channels)
    x = jax.random.normal(k_x, (B, C, T), jnp.float32)   # PyTorch NCT layout

    out = jax.block_until_ready(multi_head_attention(x, params, n_heads))
    ref = jax.block_until_ready(reference(x, params, n_heads))

    assert out.shape == (B, out_channels, T), out.shape
    # bf16 weights/activations on the MXU (f32 accumulation) vs a pure-f32
    # reference -> loosened tolerance.
    np.testing.assert_allclose(np.asarray(out.astype(jnp.float32)),
                               np.asarray(ref), rtol=5e-2, atol=5e-2)

    print("KERNEL_OK")
</pallas_src>

<mosaic_0001>
module attributes {stable_mosaic.version = 11 : i64} {
  func.func @qkv_rope_kernel(%arg0: i32, %arg1: i32, %arg2: memref<1x128x128xf32, #tpu.memory_space<vmem>>, %arg3: memref<384x128xbf16, #tpu.memory_space<vmem>>, %arg4: memref<384x1xf32, #tpu.memory_space<vmem>>, %arg5: memref<128x128xbf16, #tpu.memory_space<vmem>>, %arg6: memref<128x128xbf16, #tpu.memory_space<vmem>>, %arg7: memref<128x128xbf16, #tpu.memory_space<vmem>>, %arg8: memref<1x4x128x32xbf16, #tpu.memory_space<vmem>>, %arg9: memref<1x128x128xbf16, #tpu.memory_space<vmem>>, %arg10: memref<1x128x128xbf16, #tpu.memory_space<vmem>>) attributes {dimension_semantics = [#tpu.dimension_semantics<parallel>, #tpu.dimension_semantics<parallel>], iteration_bounds = array<i64: 1, 2>, scalar_prefetch = 0 : i64, scratch_operands = 0 : i64, tpu.core_type = #tpu.core_type<tc>, window_params = [{transform_indices = @transform_0, window_bounds = array<i64: 1, 128, 128>}, {pipeline_mode = #tpu.pipeline_mode<synchronous>, transform_indices = @transform_1, window_bounds = array<i64: 384, 128>}, {pipeline_mode = #tpu.pipeline_mode<synchronous>, transform_indices = @transform_2, window_bounds = array<i64: 384, 1>}, {transform_indices = @transform_3, window_bounds = array<i64: 128, 128>}, {transform_indices = @transform_4, window_bounds = array<i64: 128, 128>}, {transform_indices = @transform_5, window_bounds = array<i64: 128, 128>}, {transform_indices = @transform_6, window_bounds = array<i64: 1, 4, 128, 32>}, {transform_indices = @transform_7, window_bounds = array<i64: 1, 128, 128>}, {transform_indices = @transform_8, window_bounds = array<i64: 1, 128, 128>}]} {
    %c0 = arith.constant 0 : index
    %c0_0 = arith.constant 0 : index
    %c0_1 = arith.constant 0 : index
    %0 = vector.load %arg2[%c0, %c0_0, %c0_1] : memref<1x128x128xf32, #tpu.memory_space<vmem>>, vector<1x128x128xf32>
    %1 = vector.shape_cast %0 : vector<1x128x128xf32> to vector<128x128xf32>
    %2 = arith.truncf %1 : vector<128x128xf32> to vector<128x128xbf16>
    %c0_2 = arith.constant 0 : index
    %c0_3 = arith.constant 0 : index
    %3 = vector.load %arg3[%c0_2, %c0_3] : memref<384x128xbf16, #tpu.memory_space<vmem>>, vector<384x128xbf16>
    %cst = arith.constant dense<0.000000e+00> : vector<384x128xf32>
    %4 = tpu.matmul %3, %2, %cst {dimension_numbers = #tpu.dot_dimension_numbers<[1], [0], [0], [1], [0, 0, 1, 1], [], []>} : vector<384x128xbf16>, vector<128x128xbf16>, vector<384x128xf32> -> vector<384x128xf32>
    %c0_4 = arith.constant 0 : index
    %c0_5 = arith.constant 0 : index
    %5 = vector.load %arg4[%c0_4, %c0_5] : memref<384x1xf32, #tpu.memory_space<vmem>>, vector<384x1xf32>
    %6 = vector.broadcast %5 : vector<384x1xf32> to vector<384x128xf32>
    %7 = arith.addf %4, %6 : vector<384x128xf32>
    %c0_6 = arith.constant 0 : index
    %c0_7 = arith.constant 0 : index
    %8 = vector.load %arg5[%c0_6, %c0_7] : memref<128x128xbf16, #tpu.memory_space<vmem>>, vector<128x128xbf16>
    %9 = arith.extf %8 : vector<128x128xbf16> to vector<128x128xf32>
    %c0_8 = arith.constant 0 : index
    %c0_9 = arith.constant 0 : index
    %10 = vector.load %arg6[%c0_8, %c0_9] : memref<128x128xbf16, #tpu.memory_space<vmem>>, vector<128x128xbf16>
    %11 = arith.extf %10 : vector<128x128xbf16> to vector<128x128xf32>
    %c0_10 = arith.constant 0 : index
    %c0_11 = arith.constant 0 : index
    %12 = vector.load %arg7[%c0_10, %c0_11] : memref<128x128xbf16, #tpu.memory_space<vmem>>, vector<128x128xbf16>
    %13 = arith.extf %12 : vector<128x128xbf16> to vector<128x128xf32>
    %14 = vector.extract_strided_slice %7 {offsets = [0, 0], sizes = [128, 128], strides = [1, 1]} : vector<384x128xf32> to vector<128x128xf32>
    %15 = arith.mulf %14, %9 : vector<128x128xf32>
    %16 = vector.extract_strided_slice %14 {offsets = [8, 0], sizes = [120, 128], strides = [1, 1]} : vector<128x128xf32> to vector<120x128xf32>
    %17 = vector.extract_strided_slice %14 {offsets = [0, 0], sizes = [8, 128], strides = [1, 1]} : vector<128x128xf32> to vector<8x128xf32>
    %18 = tpu.concatenate %16, %17 in 0 : vector<120x128xf32>, vector<8x128xf32> -> vector<128x128xf32>
    %19 = arith.mulf %18, %11 : vector<128x128xf32>
    %20 = arith.addf %15, %19 : vector<128x128xf32>
    %21 = vector.extract_strided_slice %14 {offsets = [120, 0], sizes = [8, 128], strides = [1, 1]} : vector<128x128xf32> to vector<8x128xf32>
    %22 = vector.extract_strided_slice %14 {offsets = [0, 0], sizes = [120, 128], strides = [1, 1]} : vector<128x128xf32> to vector<120x128xf32>
    %23 = tpu.concatenate %21, %22 in 0 : vector<8x128xf32>, vector<120x128xf32> -> vector<128x128xf32>
    %24 = arith.mulf %23, %13 : vector<128x128xf32>
    %25 = arith.addf %20, %24 : vector<128x128xf32>
    %26 = vector.extract_strided_slice %7 {offsets = [128, 0], sizes = [128, 128], strides = [1, 1]} : vector<384x128xf32> to vector<128x128xf32>
    %27 = arith.mulf %26, %9 : vector<128x128xf32>
    %28 = vector.extract_strided_slice %26 {offsets = [8, 0], sizes = [120, 128], strides = [1, 1]} : vector<128x128xf32> to vector<120x128xf32>
    %29 = vector.extract_strided_slice %26 {offsets = [0, 0], sizes = [8, 128], strides = [1, 1]} : vector<128x128xf32> to vector<8x128xf32>
    %30 = tpu.concatenate %28, %29 in 0 : vector<120x128xf32>, vector<8x128xf32> -> vector<128x128xf32>
    %31 = arith.mulf %30, %11 : vector<128x128xf32>
    %32 = arith.addf %27, %31 : vector<128x128xf32>
    %33 = vector.extract_strided_slice %26 {offsets = [120, 0], sizes = [8, 128], strides = [1, 1]} : vector<128x128xf32> to vector<8x128xf32>
    %34 = vector.extract_strided_slice %26 {offsets = [0, 0], sizes = [120, 128], strides = [1, 1]} : vector<128x128xf32> to vector<120x128xf32>
    %35 = tpu.concatenate %33, %34 in 0 : vector<8x128xf32>, vector<120x128xf32> -> vector<128x128xf32>
    %36 = arith.mulf %35, %13 : vector<128x128xf32>
    %37 = arith.addf %32, %36 : vector<128x128xf32>
    %38 = vector.extract_strided_slice %7 {offsets = [256, 0], sizes = [128, 128], strides = [1, 1]} : vector<384x128xf32> to vector<128x128xf32>
    %39 = vector.extract_strided_slice %25 {offsets = [0, 0], sizes = [32, 128], strides = [1, 1]} : vector<128x128xf32> to vector<32x128xf32>
    %40 = tpu.transpose %39, [1, 0] : vector<32x128xf32> -> vector<128x32xf32>
    %41 = arith.truncf %40 : vector<128x32xf32> to vector<128x32xbf16>
    %c0_12 = arith.constant 0 : index
    %c0_13 = arith.constant 0 : index
    %c0_14 = arith.constant 0 : index
    %c0_15 = arith.constant 0 : index
    %42 = vector.load %arg8[%c0_12, %c0_13, %c0_14, %c0_15] : memref<1x4x128x32xbf16, #tpu.memory_space<vmem>>, vector<1x1x128x32xbf16>
    %43 = vector.shape_cast %42 : vector<1x1x128x32xbf16> to vector<128x32xbf16>
    %44 = vector.shape_cast %41 : vector<128x32xbf16> to vector<1x1x128x32xbf16>
    tpu.vector_store %arg8[%c0_12, %c0_13, %c0_14, %c0_15], %44 {strides = array<i32>} : memref<1x4x128x32xbf16, #tpu.memory_space<vmem>>, vector<1x1x128x32xbf16>,
    %45 = vector.extract_strided_slice %25 {offsets = [32, 0], sizes = [32, 128], strides = [1, 1]} : vector<128x128xf32> to vector<32x128xf32>
    %46 = tpu.transpose %45, [1, 0] : vector<32x128xf32> -> vector<128x32xf32>
    %47 = arith.truncf %46 : vector<128x32xf32> to vector<128x32xbf16>
    %c0_16 = arith.constant 0 : index
    %c1 = arith.constant 1 : index
    %c0_17 = arith.constant 0 : index
    %c0_18 = arith.constant 0 : index
    %48 = vector.load %arg8[%c0_16, %c1, %c0_17, %c0_18] : memref<1x4x128x32xbf16, #tpu.memory_space<vmem>>, vector<1x1x128x32xbf16>
    %49 = vector.shape_cast %48 : vector<1x1x128x32xbf16> to vector<128x32xbf16>
    %50 = vector.shape_cast %47 : vector<128x32xbf16> to vector<1x1x128x32xbf16>
    tpu.vector_store %arg8[%c0_16, %c1, %c0_17, %c0_18], %50 {strides = array<i32>} : memref<1x4x128x32xbf16, #tpu.memory_space<vmem>>, vector<1x1x128x32xbf16>,
    %51 = vector.extract_strided_slice %25 {offsets = [64, 0], sizes = [32, 128], strides = [1, 1]} : vector<128x128xf32> to vector<32x128xf32>
    %52 = tpu.transpose %51, [1, 0] : vector<32x128xf32> -> vector<128x32xf32>
    %53 = arith.truncf %52 : vector<128x32xf32> to vector<128x32xbf16>
    %c0_19 = arith.constant 0 : index
    %c2 = arith.constant 2 : index
    %c0_20 = arith.constant 0 : index
    %c0_21 = arith.constant 0 : index
    %54 = vector.load %arg8[%c0_19, %c2, %c0_20, %c0_21] : memref<1x4x128x32xbf16, #tpu.memory_space<vmem>>, vector<1x1x128x32xbf16>
    %55 = vector.shape_cast %54 : vector<1x1x128x32xbf16> to vector<128x32xbf16>
    %56 = vector.shape_cast %53 : vector<128x32xbf16> to vector<1x1x128x32xbf16>
    tpu.vector_store %arg8[%c0_19, %c2, %c0_20, %c0_21], %56 {strides = array<i32>} : memref<1x4x128x32xbf16, #tpu.memory_space<vmem>>, vector<1x1x128x32xbf16>,
    %57 = vector.extract_strided_slice %25 {offsets = [96, 0], sizes = [32, 128], strides = [1, 1]} : vector<128x128xf32> to vector<32x128xf32>
    %58 = tpu.transpose %57, [1, 0] : vector<32x128xf32> -> vector<128x32xf32>
    %59 = arith.truncf %58 : vector<128x32xf32> to vector<128x32xbf16>
    %c0_22 = arith.constant 0 : index
    %c3 = arith.constant 3 : index
    %c0_23 = arith.constant 0 : index
    %c0_24 = arith.constant 0 : index
    %60 = vector.load %arg8[%c0_22, %c3, %c0_23, %c0_24] : memref<1x4x128x32xbf16, #tpu.memory_space<vmem>>, vector<1x1x128x32xbf16>
    %61 = vector.shape_cast %60 : vector<1x1x128x32xbf16> to vector<128x32xbf16>
    %62 = vector.shape_cast %59 : vector<128x32xbf16> to vector<1x1x128x32xbf16>
    tpu.vector_store %arg8[%c0_22, %c3, %c0_23, %c0_24], %62 {strides = array<i32>} : memref<1x4x128x32xbf16, #tpu.memory_space<vmem>>, vector<1x1x128x32xbf16>,
    %63 = arith.truncf %37 : vector<128x128xf32> to vector<128x128xbf16>
    %c0_25 = arith.constant 0 : index
    %c0_26 = arith.constant 0 : index
    %c0_27 = arith.constant 0 : index
    %64 = vector.load %arg9[%c0_25, %c0_26, %c0_27] : memref<1x128x128xbf16, #tpu.memory_space<vmem>>, vector<1x128x128xbf16>
    %65 = vector.shape_cast %64 : vector<1x128x128xbf16> to vector<128x128xbf16>
    %66 = vector.shape_cast %63 : vector<128x128xbf16> to vector<1x128x128xbf16>
    tpu.vector_store %arg9[%c0_25, %c0_26, %c0_27], %66 {strides = array<i32>} : memref<1x128x128xbf16, #tpu.memory_space<vmem>>, vector<1x128x128xbf16>,
    %67 = arith.truncf %38 : vector<128x128xf32> to vector<128x128xbf16>
    %c0_28 = arith.constant 0 : index
    %c0_29 = arith.constant 0 : index
    %c0_30 = arith.constant 0 : index
    %68 = vector.load %arg10[%c0_28, %c0_29, %c0_30] : memref<1x128x128xbf16, #tpu.memory_space<vmem>>, vector<1x128x128xbf16>
    %69 = vector.shape_cast %68 : vector<1x128x128xbf16> to vector<128x128xbf16>
    %70 = vector.shape_cast %67 : vector<128x128xbf16> to vector<1x128x128xbf16>
    tpu.vector_store %arg10[%c0_28, %c0_29, %c0_30], %70 {strides = array<i32>} : memref<1x128x128xbf16, #tpu.memory_space<vmem>>, vector<1x128x128xbf16>,
    return
  }
  func.func @transform_0(%arg0: i32, %arg1: i32) -> (i32, i32, i32) {
    %c0_i32 = arith.constant 0 : i32
    %c0_i32_0 = arith.constant 0 : i32
    return %arg1, %c0_i32, %arg0 : i32, i32, i32
  }
  func.func @transform_1(%arg0: i32, %arg1: i32) -> (i32, i32) {
    %c0_i32 = arith.constant 0 : i32
    %c0_i32_0 = arith.constant 0 : i32
    %c0_i32_1 = arith.constant 0 : i32
    return %c0_i32, %c0_i32_0 : i32, i32
  }
  func.func @transform_2(%arg0: i32, %arg1: i32) -> (i32, i32) {
    %c0_i32 = arith.constant 0 : i32
    %c0_i32_0 = arith.constant 0 : i32
    %c0_i32_1 = arith.constant 0 : i32
    return %c0_i32, %c0_i32_0 : i32, i32
  }
  func.func @transform_3(%arg0: i32, %arg1: i32) -> (i32, i32) {
    %c0_i32 = arith.constant 0 : i32
    %c0_i32_0 = arith.constant 0 : i32
    return %c0_i32, %arg0 : i32, i32
  }
  func.func @transform_4(%arg0: i32, %arg1: i32) -> (i32, i32) {
    %c0_i32 = arith.constant 0 : i32
    %c0_i32_0 = arith.constant 0 : i32
    return %c0_i32, %arg0 : i32, i32
  }
  func.func @transform_5(%arg0: i32, %arg1: i32) -> (i32, i32) {
    %c0_i32 = arith.constant 0 : i32
    %c0_i32_0 = arith.constant 0 : i32
    return %c0_i32, %arg0 : i32, i32
  }
  func.func @transform_6(%arg0: i32, %arg1: i32) -> (i32, i32, i32, i32) {
    %c0_i32 = arith.constant 0 : i32
    %c0_i32_0 = arith.constant 0 : i32
    %c0_i32_1 = arith.constant 0 : i32
    return %arg1, %c0_i32, %arg0, %c0_i32_0 : i32, i32, i32, i32
  }
  func.func @transform_7(%arg0: i32, %arg1: i32) -> (i32, i32, i32) {
    %c0_i32 = arith.constant 0 : i32
    %c0_i32_0 = arith.constant 0 : i32
    return %arg1, %c0_i32, %arg0 : i32, i32, i32
  }
  func.func @transform_8(%arg0: i32, %arg1: i32) -> (i32, i32, i32) {
    %c0_i32 = arith.constant 0 : i32
    %c0_i32_0 = arith.constant 0 : i32
    return %arg1, %c0_i32, %arg0 : i32, i32, i32
  }
}

</mosaic_0001>

<bundles_post_ra>
// kernel: tpu_custom_call.1
= control target key start
LH: loop header
LB: loop body
LE: loop exit
PB: predicated region body
PF: predicated region fallthrough
CT: control target
= control target key end

     0   :  { %s4557_s0 = inlined_call_operand.vmem [shape: f32[2,128,128], index: 0, kind: input, shape index: {}]   ;;  %s4558_s1 = inlined_call_operand.hbm [shape: bf16[384,128], index: 1, kind: input, shape index: {}]   ;;  %s4559_s2 = inlined_call_operand.vmem [shape: f32[384,1], index: 2, kind: input, shape index: {}]   ;;  %s4560_s3 = inlined_call_operand.vmem [shape: bf16[128,128], index: 3, kind: input, shape index: {}]   ;;  %s4561_s4 = inlined_call_operand.vmem [shape: bf16[128,128], index: 4, kind: input, shape index: {}]   ;;  %s4562_s5 = inlined_call_operand.hbm [shape: bf16[128,128], index: 5, kind: input, shape index: {}]   ;;  %s4563_s6 = inlined_call_operand.vmem [shape: bf16[2,4,128,32], index: 6, kind: output, shape index: {0}]   ;;  %s4564_s7 = inlined_call_operand.hbm [shape: bf16[2,128,128], index: 7, kind: output, shape index: {1}]   ;;  %s4565_s8 = inlined_call_operand.hbm [shape: bf16[2,128,128], index: 8, kind: output, shape index: {2}]  }
   0x1   :  { %4593 = sst [smem:[#allocation59_spill]] %s4557_s0 }
   0x2   :  { %14 = vsyncpa [#allocation3], 0 }
   0x3   :  { %15 = vsyncpa [#allocation6], 0 }
   0x4   :  { %16 = vsyncpa [#allocation4], 0 }
   0x5   :  { %18 = vsyncpa [#allocation4 + $0x1], 0 }
   0x6   :  { %19 = vsyncpa [#allocation9], 0 }
   0x7   :  { %21 = vsyncpa [#allocation9 + $0x1], 0  ;;  %s3422_s27 = smov 0   ;;  %s3424_s28 = smov 0  }
   0x8   :  { %s3426_s29 = smov 0   ;;  %s3428_s30 = smov 0  }
   0x9   :  { %s3430_s9 = smov 0   ;;  %s3432_s10 = smov 0  }
   0xa LB: > { %4594 = sst [smem:[#allocation14_spill]] %s3354_s29  ;;  %s2287_s11 = sadd.s32 4294967295, %s3366_s10   ;;  %s3366_s10 = sphi %s3432_s10, %s27_s10   ;;  %s3362_s9 = sphi %s3430_s9, %s4795_s9   ;;  %s3358_s30 = sphi %s3428_s30, %s4794_s30   ;;  %s3354_s29 = sphi %s3426_s29, %s4793_s29   ;;  %s3350_s28 = sphi %s3424_s28, %s4797_s28   ;;  %s3346_s27 = sphi %s3422_s27, %s4796_s27  }
   0xb   : > { %4595 = sst [smem:[#allocation15_spill]] %s3362_s9  ;;  %s2288_s12 = sadd.s32 4294967294, %s3366_s10  }
   0xc   : > { %s36_s13 = sadd.s32 1, %s3362_s9  ;;  %s224_s14 = sadd.s32 1, %s3354_s29 }
   0xd   : > { %p37_p0 = scmp.ge.s32.totalorder %s36_s13, 2  ;;  %p234_p1 = scmp.ne.s32.totalorder %s3354_s29, %s3350_s28 }
   0xe   : > { %p235_p2 = scmp.eq.s32.totalorder %s2287_s11, 1  ;;  %p240_p3 = scmp.ne.s32.totalorder %s3350_s28, %s3346_s27 }
   0xf   : > { %s4799_s13 = smov (%p37_p0, %s36_s13), 0  ;;  %p241_p5 = scmp.eq.s32.totalorder %s2288_s12, 1 }
  0x10   : > { %4596 = sst [smem:[#allocation16_spill]] %s4799_s13  ;;  %p3462_p4 = por %p235_p2, %p234_p1 }
  0x11   : > { %s219_s16 = ssub.s32 %s3362_s9, %s4799_s13  ;;  %p2289_p6 = scmp.ge.s32.totalorder %s3366_s10, 1 }
  0x12   : > { %s4597_s15 = scalar_select %p3462_p4, 1, 0 }
  0x13   : > { %p222_p7 = scmp.eq.s32.totalorder %s219_s16, 0  ;;  %p3469_p8 = por %p241_p5, %p240_p3 }
  0x14   : > { %p276_p9 = scmp.lt.s32.totalorder %s3366_s10, 3  ;;  %p3481_p11 = scmp.eq.s32.totalorder %s2287_s11, 0 }
  0x15   : > { %s4598_s17 = scalar_select %p3469_p8, 1, 0 }
  0x16   : > { %s3475_s18 = scalar_select %p222_p7, %s3354_s29, %s224_s14  }
  0x17   : > { %p3477_p10 = pnand %p2289_p6, %p276_p9  ;;  %s3368_s21 = smov [#allocation2]  }
  0x18   : > { %4599 = sst [smem:[#allocation17_spill]] %s3475_s18  ;;  %s288_s22 = sshll.u32 %s3368_s21, 4  ;;  %s289_s22 = int_to_ptr.vmem [resolvable:$true] %s288_s22 }
  0x19   : > { %s4600_s19 = scalar_select %p3477_p10, 1, 0 }
  0x1a   : > { %s4601_s20 = scalar_select %p3481_p11, 1, 0 }
  0x1b   : > { %p2915_p12 = pneg %p3477_p10  ;;  %s3369_s24 = smov [#allocation5]  }
  0x1c   : > { %s320_s25 = sshll.u32 %s3369_s24, 4  ;;  %s3192_s12 = scalar_lea.hbm %s4558_s1, 3072  ;;  %s3493_s25 = int_to_ptr.vmem [resolvable:$true] %s320_s25 }
  0x1d   : > { %p3489_p13 = pnand %p3481_p11, %p2915_p12  ;;  %p3193_p0 = scmp.ne.s32.totalorder %s4558_s1, %s3192_s12 }
  0x1e   : > { %p3199_p5 = scmp.lt.u32.totalorder %s3192_s12, %s4558_s1 }
  0x1f   : > { %p3194_p1 = pneg %p3489_p13 }
  0x21   : > { %p3195_p2 = pnand %p3194_p1, %p3193_p0 }
  0x23   : > { %p3196_p3 = pneg %p3195_p2 }
  0x25   : > { %p3201_p6 = pnand %p3199_p5, %p3196_p3 }
  0x27   : > { %3204 = shalt.err (!%p3201_p6)
}
  0x28   : > { %s3205_s24 = scalar_lea.vmem %s289_s22, 3072  ;;  %p3213_p8 = scmp.lt.s32.totalorder %s289_s22, %s289_s22 }
  0x29   : > { %p3206_p7 = scmp.ne.s32.totalorder %s289_s22, %s3205_s24  ;;  %p3214_p4 = scmp.lt.s32.totalorder %s3205_s24, %s3205_s24 }
  0x2b   : > { %p3208_p9 = pnand %p3206_p7, %p3194_p1  ;;  %p3215_p11 = por %p3214_p4, %p3213_p8 }
  0x2d   : > { %p3209_p12 = pneg %p3208_p9 }
  0x2f   : > { %p3216_p10 = pnand %p3215_p11, %p3209_p12 }
  0x31   : > { %3219 = shalt.err (!%p3216_p10)
}
  0x32   : > { %s3370_s26 = smov 64   ;;  %s3371_s11 = smov 4  }
  0x33   : > { %2918 = dma.hbm_to_vmem [thread:$0]  (!%p3489_p13), %s4558_s1, 3072, %s289_s22, [#allocation3], %s3370_s26, %s3370_s26, %s3371_s11  }
  0x34   : > { %s3220_s21 = scalar_lea.hbm %s4562_s5, 1024 }
  0x35   : > { %p3221_p0 = scmp.ne.s32.totalorder %s4562_s5, %s3220_s21  ;;  %p3227_p10 = scmp.lt.u32.totalorder %s3220_s21, %s4562_s5 }
  0x37   : > { %p3223_p4 = pnand %p3221_p0, %p3194_p1 }
  0x39   : > { %p3224_p8 = pneg %p3223_p4 }
  0x3b   : > { %p3229_p11 = pnand %p3227_p10, %p3224_p8 }
  0x3d   : > { %3232 = shalt.err (!%p3229_p11)
}
  0x3e   : > { %s3233_s22 = scalar_lea.vmem %s3493_s25, 1024  ;;  %p3241_p6 = scmp.lt.s32.totalorder %s3493_s25, %s3493_s25 }
  0x3f   : > { %p3234_p2 = scmp.ne.s32.totalorder %s3493_s25, %s3233_s22  ;;  %p3242_p7 = scmp.lt.s32.totalorder %s3233_s22, %s3233_s22 }
  0x41   : > { %p3236_p3 = pnand %p3234_p2, %p3194_p1  ;;  %p3243_p9 = por %p3242_p7, %p3241_p6 }
  0x43   : > { %p3237_p5 = pneg %p3236_p3 }
  0x45   : > { %p3244_p12 = pnand %p3243_p9, %p3237_p5 }
  0x47   : > { %3247 = shalt.err (!%p3244_p12)
}
  0x48   : > { %2921 = dma.hbm_to_vmem [thread:$0]  (!%p3489_p13), %s4562_s5, 1024, %s3493_s25, [#allocation6], %s3370_s26, %s3370_s26, %s3371_s11  }
  0x49   : > { %p4603_p0 = scmp.ne.s32.totalorder %s4600_s19, 0 }
  0x4b   : > { %347 = sbr.rel (%p4603_p0) target bundleno = 607 (0x25f), region = 44 }
  0x52   : > { %p4604_p4 = scmp.ne.s32.totalorder %s4601_s20, 0 }
  0x54   : > { %3329 = dma.done.wait (%p4604_p4), [#allocation3], 3072  }
  0x55   : > { %3331 = vsyncadd (%p4604_p4), [#allocation3], 4294964224 }
  0x56   : > { %3333 = dma.done.wait (%p4604_p4), [#allocation6], 1024  }
  0x57   : > { %3335 = vsyncadd (%p4604_p4), [#allocation6], 4294966272  ;;  %p410_p1 = scmp.lt.s32.totalorder %s3358_s30, 1  ;;  %v3372_v0 = vmov 0   ;;  %s4605_s0 = sld [smem:[#allocation59_spill]]  ;;  %v511_v9 = vld [vmem:[%s4559_s2 + $0x10] sm:$0xff] }
  0x58   : > { %2991 = vset.pattern.permute.xlu1 %v3372_v0  ;;  %2990 = vset.pattern.permute.xlu0 %v3372_v0  ;;  %v509_v13 = vld [vmem:[%s4559_s2] sm:$0xff]  ;;  %v512_v14 = vld [vmem:[%s4559_s2 + $0x18] sm:$0xff]  ;;  %v510_v15 = vld [vmem:[%s4559_s2 + $0x8] sm:$0xff]  ;;  %s4054_s29 = sand.u32 1, %s3350_s28   ;;  %s2578_s25 = sshll.u32 %s3358_s30, 10 }
  0x59   : > { %s3554_s18 = scalar_select %p410_p1, %s3358_s30, 1  ;;  %569 = vperm.xlu1 %2991, %v511_v9   ;;  %559 = vperm.xlu0 %2990, %v509_v13   ;;  %v3168_v16 = vld [vmem:[#allocation2] sm:$0xff]   ;;  %v514_v21 = vld [vmem:[%s4559_s2 + $0x28] sm:$0xff]  ;;  %v516_v26 = vld [vmem:[%s4559_s2 + $0x38] sm:$0xff] }
  0x5a   : > { %v3169_v17 = vld [vmem:[#allocation2 + $0x60] sm:$0xff]   ;;  %2839 = vmatprep.mubr.bf16.mxu0 %v3168_v16  ;;  %v515_v27 = vld [vmem:[%s4559_s2 + $0x30] sm:$0xff]  ;;  %v518_v31 = vld [vmem:[%s4559_s2 + $0x48] sm:$0xff]  ;;  %s2298_s9 = sshll.u32 %s4054_s29, 6  ;;  %s4336_s12 = scalar_lea.hbm %s4564_s7, %s2578_s25 }
  0x5b   : > { %s2480_s19 = sshll.u32 %s3554_s18, 7  ;;  %2863 = vmatprep.mubr.bf16.mxu1 %v3169_v17  ;;  %v513_v22 = vld [vmem:[%s4559_s2 + $0x20] sm:$0xff]  ;;  %v520_v36 = vld [vmem:[%s4559_s2 + $0x58] sm:$0xff]  ;;  %v519_v37 = vld [vmem:[%s4559_s2 + $0x50] sm:$0xff]  ;;  %s2044_s14 = scalar_lea.sflag [#allocation4], %s4054_s29 }
  0x5c   : > { %v517_v32 = vld [vmem:[%s4559_s2 + $0x40] sm:$0xff]  ;;  %v522_v39 = vld [vmem:[%s4559_s2 + $0x68] sm:$0xff]  ;;  %v524_v43 = vld [vmem:[%s4559_s2 + $0x78] sm:$0xff]  ;;  %p4790_p8 = scmp.ne.s32.totalorder %s4597_s15, 0  ;;  %s3373_s21 = smov [#allocation7]  }
  0x5d   : > { %s3560_s26 = scalar_lea.vmem %s4605_s0, %s2480_s19  ;;  %574 = vperm.xlu1 %2991, %v512_v14   ;;  %564 = vperm.xlu0 %2990, %v510_v15   ;;  %v521_v40 = vld [vmem:[%s4559_s2 + $0x60] sm:$0xff]  ;;  %v3170_v41 = vld [vmem:[#allocation2 + $0x8] sm:$0xff]   ;;  %v523_v44 = vld [vmem:[%s4559_s2 + $0x70] sm:$0xff]  ;;  %s4127_s19 = scalar_lea.vmem [#allocation7], %s2298_s9 }
  0x5e   : > { %v437_v1 = vld [vmem:[%s3560_s26] sm:$0xff]  ;;  %v438_v2 = vld [vmem:[%s3560_s26 + $0x8] sm:$0xff]  ;;  %v439_v3 = vld [vmem:[%s3560_s26 + $0x10] sm:$0xff]  ;;  %s2067_s20 = sshll.u32 %s4127_s19, 4  ;;  %s3252_s24 = sshll.u32 %s3373_s21, 4  ;;  %s4338_s20 = int_to_ptr.vmem [resolvable:$true] %s2067_s20  ;;  %s3253_s24 = int_to_ptr.vmem [resolvable:$false] %s3252_s24 }
  0x5f   : > { %v453_v4 = vpack.c.bf16 %v438_v2, %v437_v1  ;;  %v440_v5 = vld [vmem:[%s3560_s26 + $0x18] sm:$0xff]  ;;  %v441_v7 = vld [vmem:[%s3560_s26 + $0x20] sm:$0xff]  ;;  %v442_v8 = vld [vmem:[%s3560_s26 + $0x28] sm:$0xff]  ;;  %s3248_s16 = scalar_lea.vmem %s4338_s20, 1024  ;;  %s3254_s22 = scalar_lea.vmem %s3253_s24, 2048 }
  0x60   : > { %v454_v6 = vpack.c.bf16 %v440_v5, %v439_v3  ;;  %v455_v10 = vpack.c.bf16 %v442_v8, %v441_v7  ;;  %v443_v11 = vld [vmem:[%s3560_s26 + $0x30] sm:$0xff]  ;;  %v444_v12 = vld [vmem:[%s3560_s26 + $0x38] sm:$0xff]  ;;  %v445_v19 = vld [vmem:[%s3560_s26 + $0x40] sm:$0xff]  ;;  %p3249_p13 = scmp.ne.s32.totalorder %s4338_s20, %s3248_s16  ;;  %p3255_p2 = scmp.lt.s32.totalorder %s4338_s20, %s3253_s24 }
  0x61   : > { %2823 = vmatprep.subr.bf16.mxu0 %v453_v4  ;;  %2887 = vmatprep.subr.bf16.mxu1 %v453_v4  ;;  %v456_v18 = vpack.c.bf16 %v444_v12, %v443_v11  ;;  %v446_v20 = vld [vmem:[%s3560_s26 + $0x48] sm:$0xff]  ;;  %v447_v23 = vld [vmem:[%s3560_s26 + $0x50] sm:$0xff]  ;;  %v448_v25 = vld [vmem:[%s3560_s26 + $0x58] sm:$0xff]  ;;  %p3256_p3 = scmp.lt.s32.totalorder %s3254_s22, %s3248_s16 }
  0x62   : > { %2824 = vmatpush3.bf16.msra.mxu0 %v453_v4  ;;  %2895 = vmatpush3.bf16.msra.mxu1 %v453_v4  ;;  %v457_v24 = vpack.c.bf16 %v446_v20, %v445_v19  ;;  %v449_v28 = vld [vmem:[%s3560_s26 + $0x60] sm:$0xff]  ;;  %v458_v29 = vpack.c.bf16 %v448_v25, %v447_v23  ;;  %v450_v30 = vld [vmem:[%s3560_s26 + $0x68] sm:$0xff]  ;;  %v451_v34 = vld [vmem:[%s3560_s26 + $0x70] sm:$0xff]  ;;  %p3250_p10 = pnand %p3249_p13, %p4790_p8 }
  0x63   : > { %2825 = vmatprep.subr.bf16.mxu0 %v454_v6  ;;  %2888 = vmatprep.subr.bf16.mxu1 %v454_v6  ;;  %v459_v33 = vpack.c.bf16 %v450_v30, %v449_v28  ;;  %v452_v35 = vld [vmem:[%s3560_s26 + $0x78] sm:$0xff]  ;;  %v3171_v42 = vld [vmem:[#allocation2 + $0x68] sm:$0xff]   ;;  %v3172_v45 = vld [vmem:[#allocation2 + $0x10] sm:$0xff]   ;;  %s4162_s26 = scalar_lea.vmem [#allocation8], %s2298_s9  ;;  %p3257_p5 = por %p3256_p3, %p3255_p2 }
  0x64   : > { %584 = vperm.xlu1 %2991, %v514_v21   ;;  %579 = vperm.xlu0 %2990, %v513_v22   ;;  %v460_v38 = vpack.c.bf16 %v452_v35, %v451_v34  ;;  %v3173_v46 = vld [vmem:[#allocation2 + $0x70] sm:$0xff]   ;;  %v526_v47 = vld [vmem:[%s4559_s2 + $0x88] sm:$0xff]  ;;  %v525_v48 = vld [vmem:[%s4559_s2 + $0x80] sm:$0xff]  ;;  %s2084_s23 = sshll.u32 %s4162_s26, 4  ;;  %p3251_p11 = pneg %p3250_p10  ;;  %s4327_s23 = int_to_ptr.vmem [resolvable:$true] %s2084_s23 }
  0x65   : > { %v3174_v49 = vld [vmem:[#allocation2 + $0x18] sm:$0xff]   ;;  %v527_v52 = vld [vmem:[%s4559_s2 + $0x90] sm:$0xff]  ;;  %v3176_v53 = vld [vmem:[#allocation2 + $0x20] sm:$0xff]  }
  0x66   : > { %2826 = vmatpush3.bf16.msra.mxu0 %v454_v6  ;;  %2896 = vmatpush3.bf16.msra.mxu1 %v454_v6  ;;  %v3175_v50 = vld [vmem:[#allocation2 + $0x78] sm:$0xff]   ;;  %v3177_v54 = vld [vmem:[#allocation2 + $0x80] sm:$0xff]   ;;  %v530_v55 = vld [vmem:[%s4559_s2 + $0xa8] sm:$0xff]  ;;  %p3258_p6 = pnand %p3257_p5, %p3251_p11 }
  0x67   : > { %2827 = vmatprep.subr.bf16.mxu0 %v455_v10  ;;  %2889 = vmatprep.subr.bf16.mxu1 %v455_v10  ;;  %v528_v51 = vld [vmem:[%s4559_s2 + $0x98] sm:$0xff]  ;;  %v529_v56 = vld [vmem:[%s4559_s2 + $0xa0] sm:$0xff]  ;;  %v3178_v57 = vld [vmem:[#allocation2 + $0x28] sm:$0xff]  }
  0x68   : > { %594 = vperm.xlu1 %2991, %v516_v26   ;;  %589 = vperm.xlu0 %2990, %v515_v27   ;;  %v3179_v58 = vld [vmem:[#allocation2 + $0x88] sm:$0xff]   ;;  %v532_v59 = vld [vmem:[%s4559_s2 + $0xb8] sm:$0xff]  ;;  %v531_v60 = vld [vmem:[%s4559_s2 + $0xb0] sm:$0xff] }
  0x69   : > { %v3180_v61 = vld [vmem:[#allocation2 + $0x30] sm:$0xff]   ;;  %v534_v63 = vld [vmem:[%s4559_s2 + $0xc8] sm:$0xff]  ;;  %v533_v0 = vld [vmem:[%s4559_s2 + $0xc0] sm:$0xff] }
  0x6a   : > { %2828 = vmatpush3.bf16.msra.mxu0 %v455_v10  ;;  %2897 = vmatpush3.bf16.msra.mxu1 %v455_v10  ;;  %v3181_v62 = vld [vmem:[#allocation2 + $0x90] sm:$0xff]   ;;  %v3182_v1 = vld [vmem:[#allocation2 + $0x38] sm:$0xff]   ;;  %v3184_v5 = vld [vmem:[#allocation2 + $0x40] sm:$0xff]  }
  0x6b   : > { %2829 = vmatprep.subr.bf16.mxu0 %v456_v18  ;;  %2890 = vmatprep.subr.bf16.mxu1 %v456_v18  ;;  %v3183_v2 = vld [vmem:[#allocation2 + $0x98] sm:$0xff]   ;;  %v535_v4 = vld [vmem:[%s4559_s2 + $0xd0] sm:$0xff]  ;;  %v3185_v6 = vld [vmem:[#allocation2 + $0xa0] sm:$0xff]  }
  0x6c   : > { %604 = vperm.xlu1 %2991, %v518_v31   ;;  %599 = vperm.xlu0 %2990, %v517_v32   ;;  %v536_v3 = vld [vmem:[%s4559_s2 + $0xd8] sm:$0xff]  ;;  %v538_v7 = vld [vmem:[%s4559_s2 + $0xe8] sm:$0xff]  ;;  %v537_v8 = vld [vmem:[%s4559_s2 + $0xe0] sm:$0xff] }
  0x6d   : > { %v3186_v9 = vld [vmem:[#allocation2 + $0x48] sm:$0xff]   ;;  %v540_v11 = vld [vmem:[%s4559_s2 + $0xf8] sm:$0xff]  ;;  %v539_v12 = vld [vmem:[%s4559_s2 + $0xf0] sm:$0xff] }
  0x6e   : > { %2830 = vmatpush3.bf16.msra.mxu0 %v456_v18  ;;  %2898 = vmatpush3.bf16.msra.mxu1 %v456_v18  ;;  %v3187_v10 = vld [vmem:[#allocation2 + $0xa8] sm:$0xff]   ;;  %v3188_v13 = vld [vmem:[#allocation2 + $0x50] sm:$0xff]   ;;  %v541_v16 = vld [vmem:[%s4559_s2 + $0x100] sm:$0xff] }
  0x6f   : > { %2831 = vmatprep.subr.bf16.mxu0 %v457_v24  ;;  %2891 = vmatprep.subr.bf16.mxu1 %v457_v24  ;;  %v3189_v14 = vld [vmem:[#allocation2 + $0xb0] sm:$0xff]   ;;  %v542_v15 = vld [vmem:[%s4559_s2 + $0x108] sm:$0xff]  ;;  %v3190_v17 = vld [vmem:[#allocation2 + $0x58] sm:$0xff]  }
  0x70   : > { %614 = vperm.xlu1 %2991, %v520_v36   ;;  %609 = vperm.xlu0 %2990, %v519_v37   ;;  %v3191_v18 = vld [vmem:[#allocation2 + $0xb8] sm:$0xff]   ;;  %v543_v20 = vld [vmem:[%s4559_s2 + $0x110] sm:$0xff]  ;;  %v546_v21 = vld [vmem:[%s4559_s2 + $0x128] sm:$0xff] }
  0x71   : > { %v544_v19 = vld [vmem:[%s4559_s2 + $0x118] sm:$0xff]  ;;  %v545_v22 = vld [vmem:[%s4559_s2 + $0x120] sm:$0xff]  ;;  %v550_v25 = vld [vmem:[%s4559_s2 + $0x148] sm:$0xff] }
  0x72   : > { %2832 = vmatpush3.bf16.msra.mxu0 %v457_v24  ;;  %2899 = vmatpush3.bf16.msra.mxu1 %v457_v24  ;;  %v548_v23 = vld [vmem:[%s4559_s2 + $0x138] sm:$0xff]  ;;  %v547_v24 = vld [vmem:[%s4559_s2 + $0x130] sm:$0xff]  ;;  %v549_v26 = vld [vmem:[%s4559_s2 + $0x140] sm:$0xff] }
  0x73   : > { %2833 = vmatprep.subr.bf16.mxu0 %v458_v29  ;;  %2892 = vmatprep.subr.bf16.mxu1 %v458_v29  ;;  %v552_v27 = vld [vmem:[%s4559_s2 + $0x158] sm:$0xff]  ;;  %v551_v28 = vld [vmem:[%s4559_s2 + $0x150] sm:$0xff]  ;;  %v553_v30 = vld [vmem:[%s4559_s2 + $0x160] sm:$0xff] }
  0x74   : > { %624 = vperm.xlu1 %2991, %v522_v39   ;;  %619 = vperm.xlu0 %2990, %v521_v40   ;;  %v556_v31 = vld [vmem:[%s4559_s2 + $0x178] sm:$0xff]  ;;  %v555_v32 = vld [vmem:[%s4559_s2 + $0x170] sm:$0xff] }
  0x76   : > { %2834 = vmatpush3.bf16.msra.mxu0 %v458_v29  ;;  %2900 = vmatpush3.bf16.msra.mxu1 %v458_v29  ;;  %v554_v29 = vld [vmem:[%s4559_s2 + $0x168] sm:$0xff] }
  0x77   : > { %2835 = vmatprep.subr.bf16.mxu0 %v459_v33  ;;  %2893 = vmatprep.subr.bf16.mxu1 %v459_v33 }
  0x78   : > { %634 = vperm.xlu1 %2991, %v524_v43   ;;  %629 = vperm.xlu0 %2990, %v523_v44  }
  0x7a   : > { %2836 = vmatpush3.bf16.msra.mxu0 %v459_v33  ;;  %2901 = vmatpush3.bf16.msra.mxu1 %v459_v33 }
  0x7b   : > { %2837 = vmatprep.subr.bf16.mxu0 %v460_v38  ;;  %2894 = vmatprep.subr.bf16.mxu1 %v460_v38 }
  0x7c   : > { %644 = vperm.xlu1 %2991, %v526_v47   ;;  %639 = vperm.xlu0 %2990, %v525_v48  }
  0x7e   : > { %2838 = vmatpush3.bf16.msra.mxu0 %v460_v38  ;;  %2902 = vmatpush3.bf16.msra.mxu1 %v460_v38 }
  0x80   : > { %654 = vperm.xlu1 %2991, %v528_v51   ;;  %649 = vperm.xlu0 %2990, %v527_v52  }
  0x81   : > { %2840 = vmatmul.mubr.bf16.vlgmr.msra.gmra.mrb[0].mxu0 %v3170_v41  ;;  %2864 = vmatmul.mubr.bf16.vlgmr.msra.gmra.mrb[0].mxu1 %v3171_v42 }
  0x82   : > { %2843 = vmatprep.mubr.bf16.mxu0 %v3172_v45  ;;  %2867 = vmatprep.mubr.bf16.mxu1 %v3173_v46 }
  0x84   : > { %664 = vperm.xlu1 %2991, %v530_v55   ;;  %659 = vperm.xlu0 %2990, %v529_v56  }
  0x88   : > { %674 = vperm.xlu1 %2991, %v532_v59   ;;  %669 = vperm.xlu0 %2990, %v531_v60  }
  0x89   : > { %2844 = vmatmul.mubr.bf16.gmra.mrb[4].mxu0 %v3174_v49  ;;  %2868 = vmatmul.mubr.bf16.gmra.mrb[4].mxu1 %v3175_v50 }
  0x8a   : > { %2847 = vmatprep.mubr.bf16.mxu0 %v3176_v53  ;;  %2871 = vmatprep.mubr.bf16.mxu1 %v3177_v54 }
  0x8c   : > { %684 = vperm.xlu1 %2991, %v534_v63   ;;  %679 = vperm.xlu0 %2990, %v533_v0   ;;  %v3787_v0 = vld [vmem:[%s4560_s3 + $0x8] sm:$0xff]  }
  0x8d   : > { %4621 = vst [vmem:[#allocation33_spill] sm:$0xff] %v3787_v0 }
  0x90   : > { %694 = vperm.xlu1 %2991, %v536_v3   ;;  %689 = vperm.xlu0 %2990, %v535_v4   ;;  %v3799_v3 = vld [vmem:[%s4560_s3] sm:$0xff]   ;;  %v3804_v4 = vld [vmem:[%s4561_s4 + $0x38] sm:$0xff]  }
  0x91   : > { %2848 = vmatmul.mubr.bf16.gmra.mrb[8].mxu0 %v3178_v57  ;;  %2872 = vmatmul.mubr.bf16.gmra.mrb[8].mxu1 %v3179_v58  ;;  %4624 = vst [vmem:[#allocation36_spill] sm:$0xff] %v3799_v3 }
  0x92   : > { %2851 = vmatprep.mubr.bf16.mxu0 %v3180_v61  ;;  %2875 = vmatprep.mubr.bf16.mxu1 %v3181_v62 }
  0x94   : > { %704 = vperm.xlu1 %2991, %v538_v7   ;;  %699 = vperm.xlu0 %2990, %v537_v8   ;;  %v3816_v7 = vld [vmem:[%s4561_s4 + $0x20] sm:$0xff]   ;;  %v3818_v8 = vld [vmem:[#allocation5 + $0x28] sm:$0xff]  }
  0x98   : > { %714 = vperm.xlu1 %2991, %v540_v11   ;;  %709 = vperm.xlu0 %2990, %v539_v12   ;;  %v3830_v11 = vld [vmem:[#allocation5 + $0x20] sm:$0xff]   ;;  %v4639_v12 = vunpack.c.h.bf16 %v3818_v8 }
  0x99   : > { %2852 = vmatmul.mubr.bf16.gmra.mrb[12].mxu0 %v3182_v1  ;;  %2876 = vmatmul.mubr.bf16.gmra.mrb[12].mxu1 %v3183_v2  ;;  %v3792_v1 = vld [vmem:[%s4561_s4] sm:$0xff]   ;;  %v3794_v2 = vld [vmem:[#allocation5 + $0x8] sm:$0xff]  }
  0x9a   : > { %2855 = vmatprep.mubr.bf16.mxu0 %v3184_v5  ;;  %2879 = vmatprep.mubr.bf16.mxu1 %v3185_v6  ;;  %4622 = vst [vmem:[#allocation34_spill] sm:$0xff] %v3792_v1  ;;  %4623 = vst [vmem:[#allocation35_spill] sm:$0xff] %v3794_v2  ;;  %v3806_v5 = vld [vmem:[#allocation5] sm:$0xff]   ;;  %v3811_v6 = vld [vmem:[%s4560_s3 + $0x28] sm:$0xff]  }
  0x9b   : > { %4625 = vst [vmem:[#allocation37_spill] sm:$0xff] %v3806_v5  ;;  %4626 = vst [vmem:[#allocation38_spill] sm:$0xff] %v3811_v6 }
  0x9c   : > { %724 = vperm.xlu1 %2991, %v542_v15   ;;  %719 = vperm.xlu0 %2990, %v541_v16   ;;  %v3839_v16 = vld [vmem:[%s4561_s4 + $0x8] sm:$0xff]   ;;  %v3890_v15 = vld [vmem:[%s4561_s4 + $0x30] sm:$0xff]  }
  0xa0   : > { %734 = vperm.xlu1 %2991, %v544_v19   ;;  %729 = vperm.xlu0 %2990, %v543_v20   ;;  %v3897_v19 = vld [vmem:[%s4560_s3 + $0x10] sm:$0xff]   ;;  %v4636_v20 = vunpack.c.h.bf16 %v3794_v2 }
  0xa1   : > { %2856 = vmatmul.mubr.bf16.gmra.mrb[16].mxu0 %v3186_v9  ;;  %2880 = vmatmul.mubr.bf16.gmra.mrb[16].mxu1 %v3187_v10  ;;  %v3823_v9 = vld [vmem:[%s4560_s3 + $0x20] sm:$0xff]   ;;  %v3828_v10 = vld [vmem:[%s4561_s4 + $0x18] sm:$0xff]   ;;  %4631 = vst [vmem:[#allocation43_spill] sm:$0xff] %v3897_v19 }
  0xa2   : > { %2859 = vmatprep.mubr.bf16.mxu0 %v3188_v13  ;;  %2883 = vmatprep.mubr.bf16.mxu1 %v3189_v14 }
  0xa4   : > { %744 = vperm.xlu1 %2991, %v546_v21   ;;  %739 = vperm.xlu0 %2990, %v545_v22   ;;  %v3850_v22 = vld [vmem:[%s4561_s4 + $0x28] sm:$0xff]  }
  0xa8   : > { %754 = vperm.xlu1 %2991, %v548_v23   ;;  %749 = vperm.xlu0 %2990, %v547_v24   ;;  %v3852_v23 = vld [vmem:[#allocation5 + $0x30] sm:$0xff]  }
  0xa9   : > { %2860 = vmatmul.mubr.bf16.gmra.mrb[20].mxu0 %v3190_v17  ;;  %2884 = vmatmul.mubr.bf16.gmra.mrb[20].mxu1 %v3191_v18  ;;  %v3841_v17 = vld [vmem:[#allocation5 + $0x10] sm:$0xff]  }
  0xaa   : > { %v3906_v18 = vld [vmem:[%s4560_s3 + $0x30] sm:$0xff]  }
  0xac   : > { %764 = vperm.xlu1 %2991, %v550_v25   ;;  %759 = vperm.xlu0 %2990, %v549_v26   ;;  %v3892_v26 = vld [vmem:[#allocation5 + $0x38] sm:$0xff]  }
  0xb0   : > { %774 = vperm.xlu1 %2991, %v552_v27   ;;  %769 = vperm.xlu0 %2990, %v551_v28   ;;  %v3874_v27 = vld [vmem:[%s4561_s4 + $0x10] sm:$0xff]   ;;  %v3876_v28 = vld [vmem:[#allocation5 + $0x18] sm:$0xff]  }
  0xb1   : > { %4629 = vst [vmem:[#allocation41_spill] sm:$0xff] %v3874_v27  ;;  %4630 = vst [vmem:[#allocation42_spill] sm:$0xff] %v3876_v28 }
  0xb4   : > { %784 = vperm.xlu1 %2991, %v554_v29   ;;  %779 = vperm.xlu0 %2990, %v553_v30   ;;  %v3865_v30 = vld [vmem:[%s4560_s3 + $0x18] sm:$0xff]  }
  0xb5   : > { %4628 = vst [vmem:[#allocation40_spill] sm:$0xff] %v3865_v30  ;;  %v3881_v29 = vld [vmem:[%s4560_s3 + $0x38] sm:$0xff]  }
  0xb8   : > { %794 = vperm.xlu1 %2991, %v556_v31   ;;  %789 = vperm.xlu0 %2990, %v555_v32  }
  0xd8   : > { %v3722_v33 = vpop.permute.xlu0 %559  ;;  %v3724_v34 = vpop.permute.xlu1 %569 }
  0xdc   : > { %v3726_v35 = vpop.permute.xlu0 %564  ;;  %v3728_v36 = vpop.permute.xlu1 %574 }
  0xe3   : > { %v3730_v37 = vpop.permute.xlu0 %579  ;;  %v3732_v38 = vpop.permute.xlu1 %584 }
  0xe7   : > { %v3734_v39 = vpop.permute.xlu0 %589  ;;  %v3736_v40 = vpop.permute.xlu1 %594 }
  0xeb   : > { %v3738_v41 = vpop.permute.xlu0 %599  ;;  %v3740_v42 = vpop.permute.xlu1 %604 }
  0xec   : > { %4606 = vst [vmem:[#allocation18_spill] sm:$0xff] %v3738_v41  ;;  %4607 = vst [vmem:[#allocation19_spill] sm:$0xff] %v3740_v42 }
  0xef   : > { %v3742_v43 = vpop.permute.xlu0 %609  ;;  %v3744_v44 = vpop.permute.xlu1 %614 }
  0xf0   : > { %4608 = vst [vmem:[#allocation20_spill] sm:$0xff] %v3744_v44 }
  0xf3   : > { %v3746_v45 = vpop.permute.xlu0 %619  ;;  %v3748_v46 = vpop.permute.xlu1 %624 }
  0xf4   : > { %4609 = vst [vmem:[#allocation21_spill] sm:$0xff] %v3746_v45  ;;  %4610 = vst [vmem:[#allocation22_spill] sm:$0xff] %v3748_v46 }
  0xf7   : > { %v3750_v47 = vpop.permute.xlu0 %629  ;;  %v3752_v48 = vpop.permute.xlu1 %634 }
  0xf8   : > { %4611 = vst [vmem:[#allocation23_spill] sm:$0xff] %v3750_v47  ;;  %4612 = vst [vmem:[#allocation24_spill] sm:$0xff] %v3752_v48  ;;  %v4635_v48 = vunpack.c.h.bf16 %v3792_v1 }
  0xfb   : > { %v3754_v49 = vpop.permute.xlu0 %639  ;;  %v3756_v50 = vpop.permute.xlu1 %644 }
  0xfc   : > { %4613 = vst [vmem:[#allocation25_spill] sm:$0xff] %v3754_v49  ;;  %4614 = vst [vmem:[#allocation26_spill] sm:$0xff] %v3756_v50  ;;  %v4638_v50 = vunpack.c.h.bf16 %v3816_v7 }
  0xff   : > { %v3758_v51 = vpop.permute.xlu0 %649  ;;  %v3760_v52 = vpop.permute.xlu1 %654 }
 0x100   : > { %4615 = vst [vmem:[#allocation27_spill] sm:$0xff] %v3758_v51  ;;  %4616 = vst [vmem:[#allocation28_spill] sm:$0xff] %v3760_v52 }
 0x103   : > { %v3762_v53 = vpop.permute.xlu0 %659  ;;  %v3764_v54 = vpop.permute.xlu1 %664 }
 0x104   : > { %4617 = vst [vmem:[#allocation29_spill] sm:$0xff] %v3762_v53  ;;  %4618 = vst [vmem:[#allocation30_spill] sm:$0xff] %v3764_v54  ;;  %v4641_v54 = vunpack.c.l.bf16 %v3799_v3 }
 0x107   : > { %v3766_v55 = vpop.permute.xlu0 %669  ;;  %v3768_v56 = vpop.permute.xlu1 %674 }
 0x108   : > { %4619 = vst [vmem:[#allocation31_spill] sm:$0xff] %v3766_v55  ;;  %4620 = vst [vmem:[#allocation32_spill] sm:$0xff] %v3768_v56 }
 0x10b   : > { %v3770_v57 = vpop.permute.xlu0 %679  ;;  %v3772_v58 = vpop.permute.xlu1 %684 }
 0x10f   : > { %v3774_v59 = vpop.permute.xlu0 %689  ;;  %v3776_v60 = vpop.permute.xlu1 %694 }
 0x113   : > { %v3778_v61 = vpop.permute.xlu0 %699  ;;  %v3780_v62 = vpop.permute.xlu1 %704 }
 0x117   : > { %v3782_v63 = vpop.permute.xlu0 %709  ;;  %v3854_v24 = vpop.permute.xlu1 %714 }
 0x11b   : > { %v3856_v25 = vpop.permute.xlu0 %719  ;;  %v3916_v56 = vpop.permute.xlu1 %724 }
 0x11c   : > { %4627 = vst [vmem:[#allocation39_spill] sm:$0xff] %v3856_v25  ;;  %4632 = vst [vmem:[#allocation44_spill] sm:$0xff] %v3916_v56  ;;  %v4642_v56 = vunpack.c.h.bf16 %v3804_v4 }
 0x11f   : > { %v3918_v53 = vpop.permute.xlu0 %729 }
 0x120   : > { %4633 = vst [vmem:[#allocation45_spill] sm:$0xff] %v3918_v53  ;;  %v4662_v53 = vunpack.c.h.bf16 %v3823_v9 }
 0x123   : > { %v3968_v44 = vpop.permute.xlu0 %739 }
 0x124   : > { %4645 = vst [vmem:[#allocation49_spill] sm:$0xff] %v3968_v44 }
 0x154   : > { %v2841_v55 = vpop.f32.mrb[0].mxu0  ;;  %v2865_v31 = vpop.f32.mrb[0].mxu1 }
 0x155   : > { %v984_v52 = vadd.f32 %v2841_v55, %v3724_v34  ;;  %v1080_v14 = vadd.f32 %v2865_v31, %v3774_v59  ;;  %v975_v49 = vpop.f32.mrb[1].mxu0  ;;  %v1071_v13 = vpop.f32.mrb[1].mxu1 }
 0x156   : > { %v976_v51 = vadd.f32 %v975_v49, %v3722_v33  ;;  %v2842_v46 = vpop.f32.mrb[2].mxu0  ;;  %v2866_v32 = vpop.f32.mrb[2].mxu1  ;;  %v1072_v34 = vadd.f32 %v1071_v13, %v3770_v57  ;;  %v4634_v33 = vunpack.c.l.bf16 %v3787_v0  ;;  %v4637_v57 = vunpack.c.l.bf16 %v3811_v6 }
 0x157   : > { %v978_v55 = vpop.f32.mrb[3].mxu0  ;;  %v1074_v59 = vpop.f32.mrb[3].mxu1  ;;  %v1279_v21 = vmul.f32 %v4635_v48, %v984_v52  ;;  %v3946_v45 = vmul.f32 %v4636_v20, %v984_v52  ;;  %v1367_v31 = vmul.f32 %v4638_v50, %v1080_v14  ;;  %v3954_v47 = vmul.f32 %v4639_v12, %v1080_v14 }
 0x158   : > { %v1264_v49 = vmul.f32 %v4634_v33, %v984_v52  ;;  %v1352_v13 = vmul.f32 %v4637_v57, %v1080_v14  ;;  %v1262_v33 = vmul.f32 %v4641_v54, %v976_v51  ;;  %v3960_v48 = vmul.f32 %v4642_v56, %v976_v51  ;;  %v3966_v50 = vpop.permute.xlu1 %734 }
 0x159   : > { %4640 = vst [vmem:[#allocation46_spill] sm:$0xff] %v3954_v47  ;;  %v987_v52 = vadd.f32 %v2842_v46, %v3728_v36  ;;  %v1083_v20 = vadd.f32 %v2866_v32, %v3776_v60  ;;  %v979_v57 = vadd.f32 %v978_v55, %v3726_v35  ;;  %v1075_v42 = vadd.f32 %v1074_v59, %v3772_v58 }
 0x15a   : > { %4643 = vst [vmem:[#allocation47_spill] sm:$0xff] %v3960_v48  ;;  %4644 = vst [vmem:[#allocation48_spill] sm:$0xff] %v3966_v50  ;;  %v4646_v12 = vunpack.c.h.bf16 %v3806_v5  ;;  %v4647_v54 = vunpack.c.l.bf16 %v3823_v9  ;;  %v4648_v56 = vunpack.c.h.bf16 %v3828_v10  ;;  %v4650_v36 = vunpack.c.h.bf16 %v3830_v11 }
 0x15b   : > { %v4651_v35 = vunpack.c.h.bf16 %v3787_v0  ;;  %v4652_v60 = vunpack.c.l.bf16 %v3839_v16  ;;  %v4653_v55 = vunpack.c.l.bf16 %v3841_v17  ;;  %v4660_v0 = vunpack.c.l.bf16 %v3792_v1 }
 0x15c   : > { %v1311_v14 = vmul.f32 %v4646_v12, %v976_v51  ;;  %v1350_v25 = vmul.f32 %v4647_v54, %v1072_v34  ;;  %v3976_v48 = vmul.f32 %v4648_v56, %v1072_v34  ;;  %v1399_v46 = vmul.f32 %v4650_v36, %v1072_v34  ;;  %v2845_v54 = vpop.f32.mrb[4].mxu0  ;;  %v2869_v56 = vpop.f32.mrb[4].mxu1 }
 0x15d   : > { %v1265_v58 = vmul.f32 %v4651_v35, %v987_v52  ;;  %v1280_v32 = vmul.f32 %v4652_v60, %v987_v52  ;;  %v3986_v59 = vmul.f32 %v4653_v55, %v987_v52  ;;  %v4655_v51 = vunpack.c.h.bf16 %v3811_v6  ;;  %v991_v55 = vpop.f32.mrb[5].mxu0 }
 0x15e   : > { %4649 = vst [vmem:[#allocation50_spill] sm:$0xff] %v3976_v48  ;;  %v4656_v48 = vunpack.c.l.bf16 %v3850_v22  ;;  %v4657_v34 = vunpack.c.l.bf16 %v3852_v23  ;;  %v4659_v35 = vunpack.c.h.bf16 %v3799_v3  ;;  %v1278_v52 = vmul.f32 %v4660_v0, %v979_v57 }
 0x15f   : > { %4654 = vst [vmem:[#allocation51_spill] sm:$0xff] %v3986_v59  ;;  %v3990_v12 = vmul.f32 %v4655_v51, %v1083_v20  ;;  %v1087_v59 = vpop.f32.mrb[5].mxu1  ;;  %v1296_v50 = vadd.f32 %v1280_v32, %v1264_v49  ;;  %v4661_v51 = vunpack.c.l.bf16 %v3794_v2  ;;  %v1351_v6 = vmul.f32 %v4662_v53, %v1075_v42 }
 0x160   : > { %v1368_v44 = vmul.f32 %v4656_v48, %v1083_v20  ;;  %v3996_v36 = vmul.f32 %v4657_v34, %v1083_v20  ;;  %v1263_v60 = vmul.f32 %v4659_v35, %v979_v57  ;;  %v4663_v48 = vunpack.c.l.bf16 %v3816_v7  ;;  %v2846_v20 = vpop.f32.mrb[6].mxu0  ;;  %v2870_v34 = vpop.f32.mrb[6].mxu1 }
 0x161   : > { %v1312_v41 = vmul.f32 %v4661_v51, %v979_v57  ;;  %v4008_v3 = vadd.f32 %v1278_v52, %v1262_v33  ;;  %v4664_v0 = vunpack.c.l.bf16 %v3818_v8  ;;  %v994_v5 = vpop.f32.mrb[7].mxu0  ;;  %v1090_v49 = vpop.f32.mrb[7].mxu1  ;;  %v1383_v51 = vadd.f32 %v1367_v31, %v1351_v6 }
 0x162   : > { %4658 = vst [vmem:[#allocation52_spill] sm:$0xff] %v3996_v36  ;;  %v1366_v47 = vmul.f32 %v4663_v48, %v1075_v42  ;;  %v1384_v36 = vadd.f32 %v1368_v44, %v1352_v13  ;;  %v1295_v35 = vadd.f32 %v1279_v21, %v1263_v60  ;;  %v1000_v53 = vadd.f32 %v2845_v54, %v3734_v39  ;;  %v4033_v31 = vpop.permute.xlu1 %744 }
 0x163   : > { %v1400_v1 = vmul.f32 %v4664_v0, %v1075_v42  ;;  %v4012_v32 = vadd.f32 %v1312_v41, %v1296_v50  ;;  %v1096_v44 = vadd.f32 %v2869_v56, %v3782_v63  ;;  %v992_v21 = vadd.f32 %v991_v55, %v3730_v37 }
 0x164   : > { %v4014_v57 = vadd.f32 %v1366_v47, %v1350_v25  ;;  %v4017_v2 = vadd.f32 %v1311_v14, %v1295_v35  ;;  %v4023_v13 = vadd.f32 %v1399_v46, %v1383_v51  ;;  %v4669_v42 = vunpack.c.l.bf16 %v3865_v30  ;;  %v2849_v51 = vpop.f32.mrb[8].mxu0 }
 0x165   : > { %4665 = vst [vmem:[#allocation53_spill] sm:$0xff] %v4012_v32  ;;  %v4019_v48 = vadd.f32 %v1400_v1, %v1384_v36  ;;  %v4670_v47 = vunpack.c.h.bf16 %v3874_v27  ;;  %v4671_v6 = vunpack.c.h.bf16 %v3876_v28  ;;  %v4035_v1 = vpop.permute.xlu0 %749  ;;  %v4672_v63 = vunpack.c.l.bf16 %v3881_v29 }
 0x166   : > { %4666 = vst [vmem:[#allocation54_spill] sm:$0xff] %v4014_v57  ;;  %4667 = vst [vmem:[#allocation55_spill] sm:$0xff] %v4017_v2  ;;  %v1268_v41 = vmul.f32 %v4669_v42, %v1000_v53  ;;  %v4673_v33 = vunpack.c.h.bf16 %v3890_v15  ;;  %v4674_v14 = vunpack.c.h.bf16 %v3892_v26  ;;  %v4675_v54 = vunpack.c.l.bf16 %v3897_v19 }
 0x167   : > { %4668 = vst [vmem:[#allocation56_spill] sm:$0xff] %v4023_v13  ;;  %v1283_v25 = vmul.f32 %v4670_v47, %v1000_v53  ;;  %v4031_v39 = vmul.f32 %v4671_v6, %v1000_v53  ;;  %v1356_v37 = vmul.f32 %v4672_v63, %v1096_v44  ;;  %v4676_v36 = vunpack.c.h.bf16 %v3839_v16  ;;  %v2873_v53 = vpop.f32.mrb[8].mxu1  ;;  %v1007_v63 = vpop.f32.mrb[9].mxu0 }
 0x168   : > { %v1371_v50 = vmul.f32 %v4673_v33, %v1096_v44  ;;  %v4043_v46 = vmul.f32 %v4674_v14, %v1096_v44  ;;  %v1266_v56 = vmul.f32 %v4675_v54, %v992_v21  ;;  %v4677_v52 = vunpack.c.h.bf16 %v3841_v17  ;;  %v1103_v33 = vpop.f32.mrb[9].mxu1 }
 0x169   : > { %v1281_v60 = vmul.f32 %v4676_v36, %v992_v21  ;;  %v1088_v35 = vadd.f32 %v1087_v59, %v3778_v61  ;;  %v1003_v0 = vadd.f32 %v2846_v20, %v3736_v40  ;;  %v1099_v44 = vadd.f32 %v2870_v34, %v3854_v24  ;;  %v2850_v24 = vpop.f32.mrb[10].mxu0  ;;  %v2874_v34 = vpop.f32.mrb[10].mxu1 }
 0x16a   : > { %v1315_v55 = vmul.f32 %v4677_v52, %v992_v21  ;;  %v995_v42 = vadd.f32 %v994_v5, %v3732_v38  ;;  %v1091_v47 = vadd.f32 %v1090_v49, %v3780_v62  ;;  %v1016_v6 = vadd.f32 %v2849_v51, %v3742_v43  ;;  %v1010_v52 = vpop.f32.mrb[11].mxu0  ;;  %v4078_v51 = vpop.f32.mrb[11].mxu1 }
 0x16b   : > { %v1297_v21 = vadd.f32 %v1281_v60, %v1265_v58  ;;  %v4678_v61 = vunpack.c.l.bf16 %v3906_v18  ;;  %v4679_v40 = vunpack.c.h.bf16 %v3850_v22  ;;  %v4680_v14 = vunpack.c.h.bf16 %v3852_v23 }
 0x16c   : > { %v4681_v38 = vunpack.c.h.bf16 %v3865_v30  ;;  %v4682_v43 = vunpack.c.l.bf16 %v3828_v10  ;;  %v4683_v49 = vunpack.c.l.bf16 %v3830_v11  ;;  %v4684_v36 = vunpack.c.h.bf16 %v3881_v29 }
 0x16d   : > { %v1354_v59 = vmul.f32 %v4678_v61, %v1088_v35  ;;  %v1369_v20 = vmul.f32 %v4679_v40, %v1088_v35  ;;  %v1403_v54 = vmul.f32 %v4680_v14, %v1088_v35  ;;  %v4081_v35 = vadd.f32 %v3946_v45, %v1297_v21 }
 0x16e   : > { %v1269_v62 = vmul.f32 %v4681_v38, %v1003_v0  ;;  %v1284_v5 = vmul.f32 %v4682_v43, %v1003_v0  ;;  %v4072_v58 = vmul.f32 %v4683_v49, %v1003_v0  ;;  %v4076_v60 = vmul.f32 %v4684_v36, %v1099_v44  ;;  %v4687_v38 = vld [vmem:[#allocation37_spill] sm:$0xff] }
 0x16f   : > { %4685 = vst [vmem:[#allocation57_spill] sm:$0xff] %v4081_v35  ;;  %v1385_v61 = vadd.f32 %v1369_v20, %v3990_v12  ;;  %v4686_v40 = vunpack.c.l.bf16 %v3804_v4  ;;  %v4688_v43 = vunpack.c.l.bf16 %v4687_v38  ;;  %v4690_v36 = vunpack.c.h.bf16 %v3897_v19  ;;  %v4693_v35 = vld [vmem:[#allocation46_spill] sm:$0xff]  ;;  %v2853_v19 = vpop.f32.mrb[12].mxu0 }
 0x170   : > { %v1300_v49 = vadd.f32 %v1284_v5, %v1268_v41  ;;  %v4691_v32 = vunpack.c.l.bf16 %v3874_v27  ;;  %v4692_v45 = vunpack.c.l.bf16 %v3876_v28  ;;  %v4694_v20 = vunpack.c.h.bf16 %v3906_v18  ;;  %v4104_v41 = vpop.permute.xlu0 %759  ;;  %v2877_v28 = vpop.f32.mrb[12].mxu1 }
 0x171   : > { %v1372_v14 = vmul.f32 %v4686_v40, %v1099_v44  ;;  %v4089_v0 = vmul.f32 %v4688_v43, %v1099_v44  ;;  %v1267_v13 = vmul.f32 %v4690_v36, %v995_v42  ;;  %v1417_v30 = vadd.f32 %v4693_v35, %v1385_v61  ;;  %v4102_v43 = vpop.permute.xlu1 %754 }
 0x172   : > { %v1282_v57 = vmul.f32 %v4691_v32, %v995_v42  ;;  %v1316_v21 = vmul.f32 %v4692_v45, %v995_v42  ;;  %v1355_v40 = vmul.f32 %v4694_v20, %v1091_v47  ;;  %v4695_v2 = vunpack.c.l.bf16 %v3890_v15  ;;  %v4698_v45 = vld [vmem:[#allocation38_spill] sm:$0xff] }
 0x173   : > { %4689 = vst [vmem:[#allocation37_spill] sm:$0xff] %v4089_v0  ;;  %v1388_v12 = vadd.f32 %v1372_v14, %v1356_v37  ;;  %v1299_v32 = vadd.f32 %v1283_v25, %v1267_v13  ;;  %v4697_v42 = vunpack.c.l.bf16 %v3892_v26  ;;  %v2704_v37 = vpack.c.bf16 %v1417_v30, %v4019_v48  ;;  %v1119_v30 = vpop.f32.mrb[13].mxu1  ;;  %v4704_v48 = vld [vmem:[#allocation52_spill] sm:$0xff] }
 0x174   : > { %v1370_v44 = vmul.f32 %v4695_v2, %v1091_v47  ;;  %v4106_v5 = vadd.f32 %v1282_v57, %v1266_v56  ;;  %v4108_v36 = vadd.f32 %v1316_v21, %v1300_v49  ;;  %v1387_v14 = vadd.f32 %v1371_v50, %v1355_v40 }
 0x175   : > { %v1404_v35 = vmul.f32 %v4697_v42, %v1091_v47  ;;  %v4699_v20 = vunpack.c.l.bf16 %v4698_v45  ;;  %v4115_v27 = vadd.f32 %v1315_v55, %v1299_v32  ;;  %v4702_v13 = vunpack.c.h.bf16 %v3816_v7  ;;  %v1023_v47 = vpop.f32.mrb[13].mxu0  ;;  %2781 = vst [vmem:[%s4127_s19 + $0x28] sm:$0xff] %v2704_v37   ;;  %v2878_v32 = vpop.f32.mrb[14].mxu1  ;;  %v4707_v42 = vld [vmem:[#allocation39_spill] sm:$0xff] }
 0x176   : > { %4696 = vst [vmem:[#allocation46_spill] sm:$0xff] %v4108_v36  ;;  %v1386_v61 = vadd.f32 %v1370_v44, %v1354_v59  ;;  %v4703_v56 = vunpack.c.h.bf16 %v3818_v8  ;;  %v1419_v55 = vadd.f32 %v1403_v54, %v1387_v14  ;;  %v4705_v59 = vld [vmem:[#allocation45_spill] sm:$0xff]  ;;  %v2854_v44 = vpop.f32.mrb[14].mxu0  ;;  %v4710_v36 = vld [vmem:[#allocation19_spill] sm:$0xff]  ;;  %v1122_v37 = vpop.f32.mrb[15].mxu1  ;;  %v4711_v54 = vunpack.c.l.bf16 %v3823_v9 }
 0x177   : > { %v1272_v2 = vmul.f32 %v4699_v20, %v1016_v6  ;;  %4700 = vst [vmem:[#allocation38_spill] sm:$0xff] %v4115_v27  ;;  %v4117_v57 = vadd.f32 %v1404_v35, %v1388_v12  ;;  %v1287_v25 = vmul.f32 %v4702_v13, %v1016_v6  ;;  %v1112_v21 = vadd.f32 %v2873_v53, %v4705_v59  ;;  %v4706_v12 = vld [vmem:[#allocation18_spill] sm:$0xff]  ;;  %v4708_v35 = vld [vmem:[#allocation20_spill] sm:$0xff]  ;;  %v1026_v0 = vpop.f32.mrb[15].mxu0 }
 0x178   : > { %v4123_v49 = vmul.f32 %v4703_v56, %v1016_v6  ;;  %v1418_v50 = vadd.f32 %v4704_v48, %v1386_v61  ;;  %v1008_v40 = vadd.f32 %v1007_v63, %v4706_v12  ;;  %v1104_v6 = vadd.f32 %v1103_v33, %v4707_v42  ;;  %v4709_v13 = vld [vmem:[#allocation48_spill] sm:$0xff] }
 0x179   : > { %4701 = vst [vmem:[#allocation58_spill] sm:$0xff] %v4117_v57  ;;  %v1019_v20 = vadd.f32 %v2850_v24, %v4708_v35  ;;  %v1115_v56 = vadd.f32 %v2874_v34, %v4709_v13  ;;  %v1011_v27 = vadd.f32 %v1010_v52, %v4710_v36  ;;  %v4712_v63 = vunpack.c.h.bf16 %v3828_v10 }
 0x17a   : > { %v2709_v57 = vpack.c.bf16 %v1419_v55, %v1418_v50  ;;  %v1270_v53 = vmul.f32 %v4711_v54, %v1008_v40  ;;  %v4713_v14 = vunpack.c.h.bf16 %v3830_v11  ;;  %v4714_v33 = vunpack.c.h.bf16 %v4698_v45  ;;  %v4158_v54 = vpop.permute.xlu1 %764 }
 0x17b   : > { %v1285_v61 = vmul.f32 %v4712_v63, %v1008_v40  ;;  %v4715_v34 = vunpack.c.l.bf16 %v3850_v22  ;;  %v4716_v52 = vunpack.c.l.bf16 %v3852_v23  ;;  %v2724_v50 = vpack.c.bf16 %v1115_v56, %v1112_v21  ;;  %v770_v63 = vpop.permute.xlu0 %769  ;;  %v4722_v56 = vld [vmem:[#allocation21_spill] sm:$0xff] }
 0x17c   : > { %v1319_v48 = vmul.f32 %v4713_v14, %v1008_v40  ;;  %v1273_v24 = vmul.f32 %v4714_v33, %v1019_v20  ;;  %2782 = vst [vmem:[%s4127_s19 + $0x30] sm:$0xff] %v2709_v57   ;;  %v4717_v12 = vunpack.c.h.bf16 %v3823_v9  ;;  %v4718_v35 = vunpack.c.l.bf16 %v3816_v7  ;;  %v4720_v57 = vld [vmem:[#allocation44_spill] sm:$0xff]  ;;  %v4721_v9 = vld [vmem:[#allocation23_spill] sm:$0xff]  ;;  %v2881_v33 = vpop.f32.mrb[16].mxu1 }
 0x17d   : > { %v1288_v59 = vmul.f32 %v4715_v34, %v1019_v20  ;;  %v4149_v36 = vmul.f32 %v4716_v52, %v1019_v20  ;;  %v1301_v55 = vadd.f32 %v1285_v61, %v1269_v62  ;;  %v4719_v40 = vunpack.c.l.bf16 %v3818_v8  ;;  %2784 = vst [vmem:[%s4162_s26 + $0x8] sm:$0xff] %v2724_v50   ;;  %v2857_v61 = vpop.f32.mrb[16].mxu0 }
 0x17e   : > { %v1271_v42 = vmul.f32 %v4717_v12, %v1011_v27  ;;  %v1286_v13 = vmul.f32 %v4718_v35, %v1011_v27  ;;  %v1107_v62 = vadd.f32 %v4078_v51, %v4720_v57  ;;  %v1032_v21 = vadd.f32 %v2853_v19, %v4721_v9  ;;  %v4730_v57 = vld [vmem:[#allocation24_spill] sm:$0xff] }
 0x17f   : > { %v1320_v45 = vmul.f32 %v4719_v40, %v1011_v27  ;;  %v1304_v14 = vadd.f32 %v1288_v59, %v1272_v2  ;;  %v1128_v7 = vadd.f32 %v2877_v28, %v4035_v1  ;;  %v4170_v20 = vadd.f32 %v4031_v39, %v1301_v55  ;;  %v1039_v1 = vpop.f32.mrb[17].mxu0  ;;  %v1135_v39 = vpop.f32.mrb[17].mxu1 }
 0x180   : > { %v4172_v8 = vadd.f32 %v1286_v13, %v1270_v53  ;;  %v1303_v27 = vadd.f32 %v1287_v25, %v1271_v42  ;;  %v1024_v2 = vadd.f32 %v1023_v47, %v4722_v56  ;;  %v2719_v59 = vpack.c.bf16 %v1107_v62, %v1104_v6  ;;  %v2858_v6 = vpop.f32.mrb[18].mxu0  ;;  %v2882_v35 = vpop.f32.mrb[18].mxu1  ;;  %v4731_v56 = vld [vmem:[#allocation22_spill] sm:$0xff] }
 0x181   : > { %v4175_v34 = vadd.f32 %v1320_v45, %v1304_v14  ;;  %v4723_v51 = vunpack.c.l.bf16 %v3881_v29  ;;  %v4724_v19 = vunpack.c.h.bf16 %v3890_v15  ;;  %v4725_v25 = vunpack.c.h.bf16 %v3892_v26  ;;  %v4729_v45 = vld [vmem:[#allocation49_spill] sm:$0xff]  ;;  %v1042_v9 = vpop.f32.mrb[19].mxu0 }
 0x182   : > { %v4181_v50 = vadd.f32 %v1319_v48, %v1303_v27  ;;  %v4726_v47 = vunpack.c.l.bf16 %v3906_v18  ;;  %v4727_v12 = vunpack.c.h.bf16 %v3850_v22  ;;  %2720 = vst [vmem:[%s4162_s26] sm:$0xff] %v2719_v59   ;;  %v4728_v13 = vunpack.c.h.bf16 %v3852_v23 }
 0x183   : > { %v1276_v52 = vmul.f32 %v4723_v51, %v1032_v21  ;;  %v1291_v28 = vmul.f32 %v4724_v19, %v1032_v21  ;;  %v1325_v53 = vmul.f32 %v4725_v25, %v1032_v21  ;;  %v1120_v14 = vadd.f32 %v1119_v30, %v4729_v45  ;;  %v1138_v21 = vpop.f32.mrb[19].mxu1  ;;  %v4732_v19 = vld [vmem:[#allocation27_spill] sm:$0xff] }
 0x184   : > { %v1274_v55 = vmul.f32 %v4726_v47, %v1024_v2  ;;  %v1289_v42 = vmul.f32 %v4727_v12, %v1024_v2  ;;  %v1323_v40 = vmul.f32 %v4728_v13, %v1024_v2  ;;  %v1035_v48 = vadd.f32 %v2854_v44, %v4730_v57  ;;  %v4739_v45 = vld [vmem:[#allocation47_spill] sm:$0xff] }
 0x185   : > { %v1131_v62 = vadd.f32 %v2878_v32, %v4102_v43  ;;  %v1027_v51 = vadd.f32 %v1026_v0, %v4731_v56  ;;  %v1123_v22 = vadd.f32 %v1122_v37, %v4033_v31  ;;  %v1048_v25 = vadd.f32 %v2857_v61, %v4732_v19  ;;  %v775_v32 = vpop.permute.xlu1 %774  ;;  %v4742_v56 = vld [vmem:[#allocation34_spill] sm:$0xff] }
 0x186   : > { %v1305_v27 = vadd.f32 %v1289_v42, %v1273_v24  ;;  %v4733_v59 = vunpack.c.h.bf16 %v3881_v29  ;;  %v4734_v2 = vunpack.c.l.bf16 %v3804_v4  ;;  %v4735_v44 = vunpack.c.l.bf16 %v4687_v38  ;;  %v4213_v42 = vpop.permute.xlu0 %779 }
 0x187   : > { %v2734_v43 = vpack.c.bf16 %v1131_v62, %v1128_v7  ;;  %v4736_v0 = vunpack.c.h.bf16 %v3906_v18  ;;  %v4737_v31 = vunpack.c.l.bf16 %v3890_v15  ;;  %v4738_v29 = vunpack.c.l.bf16 %v3892_v26 }
 0x188   : > { %v1277_v23 = vmul.f32 %v4733_v59, %v1035_v48  ;;  %v1292_v30 = vmul.f32 %v4734_v2, %v1035_v48  ;;  %v1310_v47 = vmul.f32 %v4735_v44, %v1035_v48  ;;  %v4205_v24 = vadd.f32 %v4123_v49, %v1305_v27  ;;  %v4740_v48 = vld [vmem:[#allocation33_spill] sm:$0xff]  ;;  %v4744_v59 = vld [vmem:[#allocation35_spill] sm:$0xff]  ;;  %v2885_v44 = vpop.f32.mrb[20].mxu1 }
 0x189   : > { %v1275_v12 = vmul.f32 %v4736_v0, %v1027_v51  ;;  %v1290_v37 = vmul.f32 %v4737_v31, %v1027_v51  ;;  %v1324_v61 = vmul.f32 %v4738_v29, %v1027_v51  ;;  %2786 = vst [vmem:[%s4162_s26 + $0x18] sm:$0xff] %v2734_v43   ;;  %v2729_v7 = vpack.c.bf16 %v1123_v22, %v1120_v14  ;;  %v2861_v51 = vpop.f32.mrb[20].mxu0  ;;  %v4746_v22 = vld [vmem:[#allocation25_spill] sm:$0xff] }
 0x18a   : > { %v1308_v13 = vadd.f32 %v1292_v30, %v1276_v52  ;;  %v1309_v57 = vadd.f32 %v4739_v45, %v1277_v23  ;;  %v4741_v49 = vunpack.c.l.bf16 %v4740_v48  ;;  %v4743_v19 = vunpack.c.h.bf16 %v4742_v56  ;;  %v1055_v30 = vpop.f32.mrb[21].mxu0  ;;  %v4748_v45 = vld [vmem:[#allocation36_spill] sm:$0xff] }
 0x18b   : > { %v1306_v27 = vadd.f32 %v1290_v37, %v1274_v55  ;;  %v1307_v18 = vadd.f32 %v1291_v28, %v1275_v12  ;;  %v4745_v2 = vunpack.c.h.bf16 %v4744_v59  ;;  %2785 = vst [vmem:[%s4162_s26 + $0x10] sm:$0xff] %v2729_v7   ;;  %v1144_v14 = vadd.f32 %v2881_v33, %v770_v63  ;;  %v1151_v55 = vpop.f32.mrb[21].mxu1  ;;  %v4747_v12 = vld [vmem:[#allocation28_spill] sm:$0xff]  ;;  %v2862_v37 = vpop.f32.mrb[22].mxu0 }
 0x18c   : > { %v1344_v62 = vmul.f32 %v4741_v49, %v1048_v25  ;;  %v1359_v15 = vmul.f32 %v4743_v19, %v1048_v25  ;;  %v4225_v0 = vadd.f32 %v1325_v53, %v1309_v57  ;;  %v4227_v52 = vadd.f32 %v1324_v61, %v1308_v13  ;;  %v2886_v29 = vpop.f32.mrb[22].mxu1  ;;  %v4752_v13 = vld [vmem:[#allocation26_spill] sm:$0xff]  ;;  %v1058_v7 = vpop.f32.mrb[23].mxu0 }
 0x18d   : > { %v4223_v26 = vmul.f32 %v4745_v2, %v1048_v25  ;;  %v1040_v23 = vadd.f32 %v1039_v1, %v4746_v22  ;;  %v4231_v28 = vadd.f32 %v1323_v40, %v1307_v18  ;;  %v1136_v43 = vadd.f32 %v1135_v39, %v4104_v41  ;;  %v1154_v49 = vpop.f32.mrb[23].mxu1  ;;  %v785_v41 = vpop.permute.xlu1 %784 }
 0x18e   : > { %v1051_v31 = vadd.f32 %v2858_v6, %v4747_v12  ;;  %v1147_v25 = vadd.f32 %v2882_v35, %v775_v32  ;;  %v4749_v53 = vunpack.c.l.bf16 %v4748_v45  ;;  %v4750_v61 = vunpack.c.h.bf16 %v3804_v4 }
 0x18f   : > { %v4751_v33 = vunpack.c.h.bf16 %v4687_v38  ;;  %v1043_v40 = vadd.f32 %v1042_v9, %v4752_v13  ;;  %v4753_v39 = vunpack.c.h.bf16 %v4740_v48  ;;  %v4754_v35 = vunpack.c.l.bf16 %v3839_v16  ;;  %v4761_v13 = vld [vmem:[#allocation37_spill] sm:$0xff] }
 0x190   : > { %v1342_v57 = vmul.f32 %v4749_v53, %v1040_v23  ;;  %v1373_v63 = vmul.f32 %v4750_v61, %v1040_v23  ;;  %v4755_v18 = vunpack.c.l.bf16 %v3841_v17  ;;  %v2744_v4 = vpack.c.bf16 %v1147_v25, %v1144_v14 }
 0x191   : > { %v1391_v1 = vmul.f32 %v4751_v33, %v1040_v23  ;;  %v1345_v6 = vmul.f32 %v4753_v39, %v1051_v31  ;;  %v1360_v32 = vmul.f32 %v4754_v35, %v1051_v31  ;;  %v4756_v38 = vunpack.c.h.bf16 %v4748_v45  ;;  %v4762_v39 = vld [vmem:[#allocation55_spill] sm:$0xff] }
 0x192   : > { %v4248_v19 = vmul.f32 %v4755_v18, %v1051_v31  ;;  %v1389_v2 = vadd.f32 %v1373_v63, %v4076_v60  ;;  %v4757_v9 = vunpack.c.l.bf16 %v4742_v56  ;;  %v4758_v12 = vunpack.c.l.bf16 %v4744_v59  ;;  %2788 = vst [vmem:[%s4162_s26 + $0x28] sm:$0xff] %v2744_v4   ;;  %v4759_v31 = vld [vmem:[#allocation51_spill] sm:$0xff]  ;;  %v4766_v4 = vld [vmem:[#allocation32_spill] sm:$0xff] }
 0x193   : > { %v1343_v22 = vmul.f32 %v4756_v38, %v1043_v40  ;;  %v1376_v53 = vadd.f32 %v1360_v32, %v1344_v62  ;;  %v1139_v61 = vadd.f32 %v1138_v21, %v4158_v54  ;;  %v1326_v33 = vadd.f32 %v1310_v47, %v4008_v3  ;;  %v790_v21 = vpop.permute.xlu0 %789  ;;  %v4760_v3 = vld [vmem:[#allocation58_spill] sm:$0xff]  ;;  %v4765_v32 = vld [vmem:[#allocation29_spill] sm:$0xff]  ;;  %v4767_v38 = vld [vmem:[#allocation40_spill] sm:$0xff] }
 0x194   : > { %v1358_v23 = vmul.f32 %v4757_v9, %v1043_v40  ;;  %v1392_v48 = vmul.f32 %v4758_v12, %v1043_v40  ;;  %v1330_v14 = vadd.f32 %v4759_v31, %v4106_v5  ;;  %v1421_v60 = vadd.f32 %v4043_v46, %v1389_v2  ;;  %v4763_v46 = vld [vmem:[#allocation38_spill] sm:$0xff] }
 0x195   : > { %v1375_v45 = vadd.f32 %v1359_v15, %v1343_v22  ;;  %v1334_v56 = vadd.f32 %v4072_v58, %v4172_v8  ;;  %v2739_v62 = vpack.c.bf16 %v1139_v61, %v1136_v43  ;;  %v1338_v54 = vadd.f32 %v4149_v36, %v1306_v27  ;;  %v795_v15 = vpop.permute.xlu1 %794  ;;  %v4764_v8 = vld [vmem:[#allocation31_spill] sm:$0xff] }
 0x196   : > { %v1374_v25 = vadd.f32 %v1358_v23, %v1342_v57  ;;  %v4265_v63 = vadd.f32 %v1392_v48, %v1376_v53  ;;  %v2992_v59 = vpack.i.bf16 %v1330_v14, %v1326_v33  ;;  %v2714_v47 = vpack.c.bf16 %v1421_v60, %v4760_v3  ;;  %v4769_v23 = vld [vmem:[#allocation41_spill] sm:$0xff]  ;;  %v4771_v53 = vld [vmem:[#allocation42_spill] sm:$0xff] }
 0x197   : > { %v1407_v5 = vadd.f32 %v1391_v1, %v1375_v45  ;;  %v2994_v57 = vpack.i.bf16 %v4763_v46, %v4762_v39  ;;  %2787 = vst [vmem:[%s4162_s26 + $0x20] sm:$0xff] %v2739_v62   ;;  %v3080_v58 = vpack.i.bf16 %v1338_v54, %v1334_v56  ;;  %v1064_v35 = vadd.f32 %v2861_v51, %v4764_v8  ;;  %v4780_v54 = vld [vmem:[#allocation30_spill] sm:$0xff] }
 0x198   : > { %v1406_v40 = vadd.f32 %v4761_v13, %v1374_v25  ;;  %2993 = vxpose.xlu0.b32.start [1/4] (short) %v2992_v59, 128  ;;  %v1160_v43 = vadd.f32 %v2885_v44, %v790_v21  ;;  %v1056_v18 = vadd.f32 %v1055_v30, %v4765_v32  ;;  %2783 = vst [vmem:[%s4127_s19 + $0x38] sm:$0xff] %v2714_v47   ;;  %v4768_v22 = vunpack.c.l.bf16 %v4767_v38  ;;  %v4773_v44 = vld [vmem:[#allocation43_spill] sm:$0xff] }
 0x199   : > { %v1152_v27 = vadd.f32 %v1151_v55, %v4213_v42  ;;  %v1067_v2 = vadd.f32 %v2862_v37, %v4766_v4  ;;  %v1163_v1 = vadd.f32 %v2886_v29, %v795_v15  ;;  %3081 = vxpose.xlu1.b32.start [1/4] (short) %v3080_v58, 128  ;;  %v4770_v12 = vunpack.c.h.bf16 %v4769_v23  ;;  %v4788_v58 = vld [vmem:[#allocation56_spill] sm:$0xff] }
 0x19a   : > { %v2679_v36 = vpack.c.bf16 %v1407_v5, %v1406_v40  ;;  %v1348_v9 = vmul.f32 %v4768_v22, %v1064_v35  ;;  %v4772_v61 = vunpack.c.h.bf16 %v4771_v53  ;;  %v4774_v33 = vunpack.c.l.bf16 %v4773_v44  ;;  %v4782_v40 = vld [vmem:[#allocation54_spill] sm:$0xff] }
 0x19b   : > { %v1363_v48 = vmul.f32 %v4770_v12, %v1064_v35  ;;  %v4775_v42 = vunpack.c.h.bf16 %v3839_v16  ;;  %v4776_v37 = vunpack.c.h.bf16 %v3841_v17  ;;  %v4777_v31 = vunpack.c.h.bf16 %v4767_v38  ;;  %v4781_v17 = vld [vmem:[#allocation50_spill] sm:$0xff] }
 0x19c   : > { %v1397_v51 = vmul.f32 %v4772_v61, %v1064_v35  ;;  %v1346_v30 = vmul.f32 %v4774_v33, %v1056_v18  ;;  %2680 = vst [vmem:[%s4127_s19] sm:$0xff] %v2679_v36   ;;  %v4778_v60 = vunpack.c.l.bf16 %v3828_v10  ;;  %2995 = vxpose.xlu0.b32.cont [2/4] (short) %v2994_v57, 128  ;;  %v4779_v45 = vunpack.c.l.bf16 %v3830_v11  ;;  %v4789_v36 = vld [vmem:[#allocation57_spill] sm:$0xff] }
 0x19d   : > { %v1361_v55 = vmul.f32 %v4775_v42, %v1056_v18  ;;  %v1395_v29 = vmul.f32 %v4776_v37, %v1056_v18  ;;  %v1349_v14 = vmul.f32 %v4777_v31, %v1067_v2  ;;  %v2754_v62 = vpack.c.bf16 %v1163_v1, %v1160_v43 }
 0x19e   : > { %v1364_v25 = vmul.f32 %v4778_v60, %v1067_v2  ;;  %v1398_v56 = vmul.f32 %v4779_v45, %v1067_v2  ;;  %v3082_v59 = vpack.i.bf16 %v4231_v28, %v4181_v50  ;;  %v1059_v16 = vadd.f32 %v1058_v7, %v4780_v54 }
 0x19f   : > { %v1377_v21 = vadd.f32 %v1361_v55, %v1345_v6  ;;  %v1381_v47 = vadd.f32 %v4781_v17, %v1349_v14  ;;  %v1155_v13 = vadd.f32 %v1154_v49, %v785_v41  ;;  %2790 = vst [vmem:[%s4162_s26 + $0x38] sm:$0xff] %v2754_v62   ;;  %v4783_v10 = vunpack.c.h.bf16 %v4773_v44  ;;  %v4786_v49 = vld [vmem:[#allocation53_spill] sm:$0xff]  ;;  %v4787_v41 = vld [vmem:[#allocation46_spill] sm:$0xff] }
 0x1a0   : > { %v1380_v3 = vadd.f32 %v1364_v25, %v1348_v9  ;;  %v1414_v5 = vadd.f32 %v1398_v56, %v4782_v40  ;;  %3083 = vxpose.xlu1.b32.cont [2/4] (short) %v3082_v59, 128  ;;  %v4784_v39 = vunpack.c.l.bf16 %v4769_v23  ;;  %v4785_v50 = vunpack.c.l.bf16 %v4771_v53 }
 0x1a1   : > { %v1347_v11 = vmul.f32 %v4783_v10, %v1059_v16  ;;  %v1409_v7 = vadd.f32 %v4223_v26, %v1377_v21  ;;  %v1413_v6 = vadd.f32 %v1397_v51, %v1381_v47  ;;  %v2749_v57 = vpack.c.bf16 %v1155_v13, %v1152_v27 }
 0x1a2   : > { %v1362_v46 = vmul.f32 %v4784_v39, %v1059_v16  ;;  %v1396_v28 = vmul.f32 %v4785_v50, %v1059_v16  ;;  %v2996_v15 = vpack.i.bf16 %v4787_v41, %v4786_v49  ;;  %v2699_v8 = vpack.c.bf16 %v4788_v58, %v1414_v5 }
 0x1a3   : > { %v1379_v43 = vadd.f32 %v1363_v48, %v1347_v11  ;;  %v2684_v18 = vpack.c.bf16 %v1409_v7, %v4265_v63  ;;  %2789 = vst [vmem:[%s4162_s26 + $0x30] sm:$0xff] %v2749_v57   ;;  %v3084_v26 = vpack.i.bf16 %v4227_v52, %v4175_v34  ;;  %v2998_v27 = vpack.i.bf16 %v4170_v20, %v4789_v36 }
 0x1a4   : > { %v1378_v35 = vadd.f32 %v1362_v46, %v1346_v30  ;;  %v1412_v32 = vadd.f32 %v1396_v28, %v1380_v3  ;;  %2997 = vxpose.xlu0.b32.cont [3/4] (short) %v2996_v15, 128  ;;  %v3086_v4 = vpack.i.bf16 %v4225_v0, %v4205_v24  ;;  %2780 = vst [vmem:[%s4127_s19 + $0x20] sm:$0xff] %v2699_v8  }
 0x1a5   : > { %v1411_v63 = vadd.f32 %v1395_v29, %v1379_v43  ;;  %2777 = vst [vmem:[%s4127_s19 + $0x8] sm:$0xff] %v2684_v18   ;;  %3085 = vxpose.xlu1.b32.cont [3/4] (short) %v3084_v26, 128 }
 0x1a6   : > { %v1410_v2 = vadd.f32 %v4248_v19, %v1378_v35  ;;  %v2694_v1 = vpack.c.bf16 %v1413_v6, %v1412_v32 }
 0x1a8   : > { %v2689_v38 = vpack.c.bf16 %v1411_v63, %v1410_v2  ;;  %2779 = vst [vmem:[%s4127_s19 + $0x18] sm:$0xff] %v2694_v1   ;;  %2999 = vxpose.xlu0.b32.end [4/4] (short) %v2998_v27, 128 }
 0x1a9   : > { %3087 = vxpose.xlu1.b32.end [4/4] (short) %v3086_v4, 128 }
 0x1aa   : > { %2778 = vst [vmem:[%s4127_s19 + $0x10] sm:$0xff] %v2689_v38  }
 0x1ab   : > { %3261 = shalt.err (!%p3258_p6)
}
 0x1ac   : > { %s3262_s9 = scalar_lea.hbm %s4336_s12, 1024  ;;  %s3266_s11 = scalar_lea.hbm %s4564_s7, 2048 }
 0x1ad   : > { %p3263_p7 = scmp.ne.s32.totalorder %s4336_s12, %s3262_s9  ;;  %p3267_p0 = scmp.lt.u32.totalorder %s4336_s12, %s4564_s7 }
 0x1ae   : > { %p3268_p4 = scmp.lt.u32.totalorder %s3266_s11, %s3262_s9  ;;  %p3270_p13 = scmp.lt.u32.totalorder %s3262_s9, %s4336_s12 }
 0x1af   : > { %p3264_p9 = pnand %p3263_p7, %p4790_p8 }
 0x1b0   : > { %p3269_p1 = por %p3268_p4, %p3267_p0 }
 0x1b1   : > { %p3265_p12 = pneg %p3264_p9 }
 0x1b2   : > { %p3271_p10 = por %p3270_p13, %p3269_p1 }
 0x1b4   : > { %p3272_p11 = pnand %p3271_p10, %p3265_p12 }
 0x1b6   : > { %3275 = shalt.err (!%p3272_p11)
}
 0x1b7   : > { %s3374_s16 = smov 64   ;;  %s3375_s24 = smov 4  }
 0x1b8   : > { %2911 = dma.vmem_to_hbm [thread:$0]  (%p4790_p8), %s4338_s20, 1024, %s4336_s12, %s2044_s14, %s3374_s16, %s3374_s16, %s3375_s24  }
 0x1b9   : > { %s4372_s19 = scalar_lea.hbm %s4565_s8, %s2578_s25  ;;  %s2049_s26 = scalar_lea.sflag [#allocation9], %s4054_s29 }
 0x1ba   : > { %s3276_s11 = scalar_lea.vmem %s4327_s23, 1024  ;;  %s3376_s13 = smov [#allocation8]  }
 0x1bb   : > { %p3277_p2 = scmp.ne.s32.totalorder %s4327_s23, %s3276_s11  ;;  %s3280_s21 = sshll.u32 %s3376_s13, 4  ;;  %s3281_s21 = int_to_ptr.vmem [resolvable:$false] %s3280_s21 }
 0x1bc   : > { %s3282_s0 = scalar_lea.vmem %s3281_s21, 2048  ;;  %p3283_p6 = scmp.lt.s32.totalorder %s4327_s23, %s3281_s21 }
 0x1bd   : > { %p3278_p3 = pnand %p3277_p2, %p4790_p8  ;;  %p3284_p7 = scmp.lt.s32.totalorder %s3282_s0, %s3276_s11 }
 0x1bf   : > { %p3279_p5 = pneg %p3278_p3  ;;  %p3285_p9 = por %p3284_p7, %p3283_p6 }
 0x1c1   : > { %p3286_p12 = pnand %p3285_p9, %p3279_p5 }
 0x1c3   : > { %3289 = shalt.err (!%p3286_p12)
}
 0x1c4   : > { %s3290_s30 = scalar_lea.hbm %s4372_s19, 1024  ;;  %s3294_s12 = scalar_lea.hbm %s4565_s8, 2048 }
 0x1c5   : > { %p3291_p0 = scmp.ne.s32.totalorder %s4372_s19, %s3290_s30  ;;  %p3295_p13 = scmp.lt.u32.totalorder %s4372_s19, %s4565_s8 }
 0x1c6   : > { %p3296_p10 = scmp.lt.u32.totalorder %s3294_s12, %s3290_s30  ;;  %p3298_p2 = scmp.lt.u32.totalorder %s3290_s30, %s4372_s19 }
 0x1c7   : > { %p3292_p4 = pnand %p3291_p0, %p4790_p8 }
 0x1c8   : > { %p3297_p11 = por %p3296_p10, %p3295_p13 }
 0x1c9   : > { %p3293_p1 = pneg %p3292_p4 }
 0x1ca   : > { %p3299_p3 = por %p3298_p2, %p3297_p11 }
 0x1cc   : > { %p3300_p5 = pnand %p3299_p3, %p3293_p1 }
 0x1ce   : > { %3303 = shalt.err (!%p3300_p5)
}
 0x1cf   : > { %2912 = dma.vmem_to_hbm [thread:$0]  (%p4790_p8), %s4327_s23, 1024, %s4372_s19, %s2049_s26, %s3374_s16, %s3374_s16, %s3375_s24   ;;  %vm1518_vm0 = vcmask 257024  }
 0x1d0   : > { %s2481_s0 = sshll.u32 %s3554_s18, 8 }
 0x1d1   : > { %s4405_s13 = scalar_lea.vmem %s4563_s6, %s2481_s0 }
 0x21c   : > { %v3000_v20 = vpop.trf.xlu0 }
 0x21d   : > { %v3004_v34 = vunpack.i.h.bf16 %v3000_v20  ;;  %v3001_v24 = vunpack.i.l.bf16 %v3000_v20  ;;  %v3088_v0 = vpop.trf.xlu1 }
 0x21e   : > { %v3092_v52 = vunpack.i.h.bf16 %v3088_v0  ;;  %v3089_v19 = vunpack.i.l.bf16 %v3088_v0 }
 0x21f   : > { %v2498_v22 = vpack.c.bf16 %v3004_v34, %v3004_v34  ;;  %v2482_v9 = vpack.c.bf16 %v3001_v24, %v3001_v24 }
 0x220   : > { %v3005_v23 = vpop.trf.xlu0  ;;  %v2530_v12 = vpack.c.bf16 %v3092_v52, %v3092_v52  ;;  %v2514_v48 = vpack.c.bf16 %v3089_v19, %v3089_v19 }
 0x221   : > { %v3009_v53 = vunpack.i.h.bf16 %v3005_v23  ;;  %2360 = vst.msk [vmem:[%s4405_s13 + $0x40] sm:$0xf] %vm1518_vm0, %v2498_v22  ;;  %1519 = vst.msk [vmem:[%s4405_s13] sm:$0xf] %vm1518_vm0, %v2482_v9  ;;  %v3093_v61 = vpop.trf.xlu1  ;;  %v3006_v51 = vunpack.i.l.bf16 %v3005_v23 }
 0x222   : > { %2424 = vst.msk [vmem:[%s4405_s13 + $0xc0] sm:$0xf] %vm1518_vm0, %v2530_v12  ;;  %2392 = vst.msk [vmem:[%s4405_s13 + $0x80] sm:$0xf] %vm1518_vm0, %v2514_v48  ;;  %v3097_v44 = vunpack.i.h.bf16 %v3093_v61  ;;  %v3094_v33 = vunpack.i.l.bf16 %v3093_v61 }
 0x223   : > { %v2499_v30 = vpack.c.bf16 %v3009_v53, %v3009_v53  ;;  %v2483_v42 = vpack.c.bf16 %v3006_v51, %v3006_v51 }
 0x224   : > { %v3010_v55 = vpop.trf.xlu0  ;;  %v2531_v37 = vpack.c.bf16 %v3097_v44, %v3097_v44  ;;  %v2515_v29 = vpack.c.bf16 %v3094_v33, %v3094_v33 }
 0x225   : > { %v3014_v31 = vunpack.i.h.bf16 %v3010_v55  ;;  %2361 = vst.msk [vmem:[%s4405_s13 + $0x44] sm:$0xf] %vm1518_vm0, %v2499_v30  ;;  %1520 = vst.msk [vmem:[%s4405_s13 + $0x4] sm:$0xf] %vm1518_vm0, %v2483_v42  ;;  %v3098_v14 = vpop.trf.xlu1  ;;  %v3011_v60 = vunpack.i.l.bf16 %v3010_v55 }
 0x226   : > { %2425 = vst.msk [vmem:[%s4405_s13 + $0xc4] sm:$0xf] %vm1518_vm0, %v2531_v37  ;;  %2393 = vst.msk [vmem:[%s4405_s13 + $0x84] sm:$0xf] %vm1518_vm0, %v2515_v29  ;;  %v3102_v25 = vunpack.i.h.bf16 %v3098_v14  ;;  %v3099_v45 = vunpack.i.l.bf16 %v3098_v14 }
 0x227   : > { %v2500_v56 = vpack.c.bf16 %v3014_v31, %v3014_v31  ;;  %v2484_v62 = vpack.c.bf16 %v3011_v60, %v3011_v60 }
 0x228   : > { %v3015_v59 = vpop.trf.xlu0  ;;  %v2532_v54 = vpack.c.bf16 %v3102_v25, %v3102_v25  ;;  %v2516_v16 = vpack.c.bf16 %v3099_v45, %v3099_v45 }
 0x229   : > { %v3019_v21 = vunpack.i.h.bf16 %v3015_v59  ;;  %2362 = vst.msk [vmem:[%s4405_s13 + $0x48] sm:$0xf] %vm1518_vm0, %v2500_v56  ;;  %1521 = vst.msk [vmem:[%s4405_s13 + $0x8] sm:$0xf] %vm1518_vm0, %v2484_v62  ;;  %v3103_v3 = vpop.trf.xlu1  ;;  %v3016_v17 = vunpack.i.l.bf16 %v3015_v59 }
 0x22a   : > { %2426 = vst.msk [vmem:[%s4405_s13 + $0xc8] sm:$0xf] %vm1518_vm0, %v2532_v54  ;;  %2394 = vst.msk [vmem:[%s4405_s13 + $0x88] sm:$0xf] %vm1518_vm0, %v2516_v16  ;;  %v3107_v47 = vunpack.i.h.bf16 %v3103_v3  ;;  %v3104_v13 = vunpack.i.l.bf16 %v3103_v3 }
 0x22b   : > { %v2501_v40 = vpack.c.bf16 %v3019_v21, %v3019_v21  ;;  %v2485_v5 = vpack.c.bf16 %v3016_v17, %v3016_v17 }
 0x22c   : > { %v3020_v10 = vpop.trf.xlu0  ;;  %v2533_v11 = vpack.c.bf16 %v3107_v47, %v3107_v47  ;;  %v2517_v39 = vpack.c.bf16 %v3104_v13, %v3104_v13 }
 0x22d   : > { %v3024_v46 = vunpack.i.h.bf16 %v3020_v10  ;;  %2363 = vst.msk [vmem:[%s4405_s13 + $0x4c] sm:$0xf] %vm1518_vm0, %v2501_v40  ;;  %1522 = vst.msk [vmem:[%s4405_s13 + $0xc] sm:$0xf] %vm1518_vm0, %v2485_v5  ;;  %v3108_v50 = vpop.trf.xlu1  ;;  %v3021_v28 = vunpack.i.l.bf16 %v3020_v10 }
 0x22e   : > { %2427 = vst.msk [vmem:[%s4405_s13 + $0xcc] sm:$0xf] %vm1518_vm0, %v2533_v11  ;;  %2395 = vst.msk [vmem:[%s4405_s13 + $0x8c] sm:$0xf] %vm1518_vm0, %v2517_v39  ;;  %v3112_v7 = vunpack.i.h.bf16 %v3108_v50  ;;  %v3109_v6 = vunpack.i.l.bf16 %v3108_v50 }
 0x22f   : > { %v2502_v57 = vpack.c.bf16 %v3024_v46, %v3024_v46  ;;  %v2486_v49 = vpack.c.bf16 %v3021_v28, %v3021_v28 }
 0x230   : > { %v3025_v41 = vpop.trf.xlu0  ;;  %v2534_v15 = vpack.c.bf16 %v3112_v7, %v3112_v7  ;;  %v2518_v58 = vpack.c.bf16 %v3109_v6, %v3109_v6 }
 0x231   : > { %v3029_v8 = vunpack.i.h.bf16 %v3025_v41  ;;  %2364 = vst.msk [vmem:[%s4405_s13 + $0x50] sm:$0xf] %vm1518_vm0, %v2502_v57  ;;  %1523 = vst.msk [vmem:[%s4405_s13 + $0x10] sm:$0xf] %vm1518_vm0, %v2486_v49  ;;  %v3113_v35 = vpop.trf.xlu1  ;;  %v3026_v43 = vunpack.i.l.bf16 %v3025_v41 }
 0x232   : > { %2428 = vst.msk [vmem:[%s4405_s13 + $0xd0] sm:$0xf] %vm1518_vm0, %v2534_v15  ;;  %2396 = vst.msk [vmem:[%s4405_s13 + $0x90] sm:$0xf] %vm1518_vm0, %v2518_v58  ;;  %v3117_v32 = vunpack.i.h.bf16 %v3113_v35  ;;  %v3114_v18 = vunpack.i.l.bf16 %v3113_v35 }
 0x233   : > { %v2503_v26 = vpack.c.bf16 %v3029_v8, %v3029_v8  ;;  %v2487_v36 = vpack.c.bf16 %v3026_v43, %v3026_v43 }
 0x234   : > { %v3030_v27 = vpop.trf.xlu0  ;;  %v2535_v4 = vpack.c.bf16 %v3117_v32, %v3117_v32  ;;  %v2519_v2 = vpack.c.bf16 %v3114_v18, %v3114_v18 }
 0x235   : > { %v3034_v63 = vunpack.i.h.bf16 %v3030_v27  ;;  %2365 = vst.msk [vmem:[%s4405_s13 + $0x54] sm:$0xf] %vm1518_vm0, %v2503_v26  ;;  %1524 = vst.msk [vmem:[%s4405_s13 + $0x14] sm:$0xf] %vm1518_vm0, %v2487_v36  ;;  %v3118_v1 = vpop.trf.xlu1  ;;  %v3031_v38 = vunpack.i.l.bf16 %v3030_v27 }
 0x236   : > { %2429 = vst.msk [vmem:[%s4405_s13 + $0xd4] sm:$0xf] %vm1518_vm0, %v2535_v4  ;;  %2397 = vst.msk [vmem:[%s4405_s13 + $0x94] sm:$0xf] %vm1518_vm0, %v2519_v2  ;;  %v3122_v20 = vunpack.i.h.bf16 %v3118_v1  ;;  %v3119_v34 = vunpack.i.l.bf16 %v3118_v1 }
 0x237   : > { %v2504_v24 = vpack.c.bf16 %v3034_v63, %v3034_v63  ;;  %v2488_v0 = vpack.c.bf16 %v3031_v38, %v3031_v38 }
 0x238   : > { %v3035_v52 = vpop.trf.xlu0  ;;  %v2536_v19 = vpack.c.bf16 %v3122_v20, %v3122_v20  ;;  %v2520_v22 = vpack.c.bf16 %v3119_v34, %v3119_v34 }
 0x239   : > { %v3039_v9 = vunpack.i.h.bf16 %v3035_v52  ;;  %2366 = vst.msk [vmem:[%s4405_s13 + $0x58] sm:$0xf] %vm1518_vm0, %v2504_v24  ;;  %1525 = vst.msk [vmem:[%s4405_s13 + $0x18] sm:$0xf] %vm1518_vm0, %v2488_v0  ;;  %v3123_v23 = vpop.trf.xlu1  ;;  %v3036_v12 = vunpack.i.l.bf16 %v3035_v52 }
 0x23a   : > { %2430 = vst.msk [vmem:[%s4405_s13 + $0xd8] sm:$0xf] %vm1518_vm0, %v2536_v19  ;;  %2398 = vst.msk [vmem:[%s4405_s13 + $0x98] sm:$0xf] %vm1518_vm0, %v2520_v22  ;;  %v3127_v48 = vunpack.i.h.bf16 %v3123_v23  ;;  %v3124_v53 = vunpack.i.l.bf16 %v3123_v23 }
 0x23b   : > { %v2505_v61 = vpack.c.bf16 %v3039_v9, %v3039_v9  ;;  %v2489_v51 = vpack.c.bf16 %v3036_v12, %v3036_v12 }
 0x23c   : > { %v3040_v44 = vpop.trf.xlu0  ;;  %v2537_v33 = vpack.c.bf16 %v3127_v48, %v3127_v48  ;;  %v2521_v30 = vpack.c.bf16 %v3124_v53, %v3124_v53 }
 0x23d   : > { %v3044_v42 = vunpack.i.h.bf16 %v3040_v44  ;;  %2367 = vst.msk [vmem:[%s4405_s13 + $0x5c] sm:$0xf] %vm1518_vm0, %v2505_v61  ;;  %1526 = vst.msk [vmem:[%s4405_s13 + $0x1c] sm:$0xf] %vm1518_vm0, %v2489_v51  ;;  %v3128_v55 = vpop.trf.xlu1  ;;  %v3041_v37 = vunpack.i.l.bf16 %v3040_v44 }
 0x23e   : > { %2431 = vst.msk [vmem:[%s4405_s13 + $0xdc] sm:$0xf] %vm1518_vm0, %v2537_v33  ;;  %2399 = vst.msk [vmem:[%s4405_s13 + $0x9c] sm:$0xf] %vm1518_vm0, %v2521_v30  ;;  %v3132_v29 = vunpack.i.h.bf16 %v3128_v55  ;;  %v3129_v31 = vunpack.i.l.bf16 %v3128_v55 }
 0x23f   : > { %v2506_v14 = vpack.c.bf16 %v3044_v42, %v3044_v42  ;;  %v2490_v60 = vpack.c.bf16 %v3041_v37, %v3041_v37 }
 0x240   : > { %v3045_v25 = vpop.trf.xlu0  ;;  %v2538_v45 = vpack.c.bf16 %v3132_v29, %v3132_v29  ;;  %v2522_v56 = vpack.c.bf16 %v3129_v31, %v3129_v31 }
 0x241   : > { %v3049_v62 = vunpack.i.h.bf16 %v3045_v25  ;;  %2368 = vst.msk [vmem:[%s4405_s13 + $0x60] sm:$0xf] %vm1518_vm0, %v2506_v14  ;;  %1527 = vst.msk [vmem:[%s4405_s13 + $0x20] sm:$0xf] %vm1518_vm0, %v2490_v60  ;;  %v3133_v59 = vpop.trf.xlu1  ;;  %v3046_v54 = vunpack.i.l.bf16 %v3045_v25 }
 0x242   : > { %2432 = vst.msk [vmem:[%s4405_s13 + $0xe0] sm:$0xf] %vm1518_vm0, %v2538_v45  ;;  %2400 = vst.msk [vmem:[%s4405_s13 + $0xa0] sm:$0xf] %vm1518_vm0, %v2522_v56  ;;  %v3137_v16 = vunpack.i.h.bf16 %v3133_v59  ;;  %v3134_v21 = vunpack.i.l.bf16 %v3133_v59 }
 0x243   : > { %v2507_v3 = vpack.c.bf16 %v3049_v62, %v3049_v62  ;;  %v2491_v17 = vpack.c.bf16 %v3046_v54, %v3046_v54 }
 0x244   : > { %v3050_v47 = vpop.trf.xlu0  ;;  %v2539_v13 = vpack.c.bf16 %v3137_v16, %v3137_v16  ;;  %v2523_v40 = vpack.c.bf16 %v3134_v21, %v3134_v21 }
 0x245   : > { %v3054_v5 = vunpack.i.h.bf16 %v3050_v47  ;;  %2369 = vst.msk [vmem:[%s4405_s13 + $0x64] sm:$0xf] %vm1518_vm0, %v2507_v3  ;;  %1528 = vst.msk [vmem:[%s4405_s13 + $0x24] sm:$0xf] %vm1518_vm0, %v2491_v17  ;;  %v3138_v10 = vpop.trf.xlu1  ;;  %v3051_v11 = vunpack.i.l.bf16 %v3050_v47 }
 0x246   : > { %2433 = vst.msk [vmem:[%s4405_s13 + $0xe4] sm:$0xf] %vm1518_vm0, %v2539_v13  ;;  %2401 = vst.msk [vmem:[%s4405_s13 + $0xa4] sm:$0xf] %vm1518_vm0, %v2523_v40  ;;  %v3142_v39 = vunpack.i.h.bf16 %v3138_v10  ;;  %v3139_v46 = vunpack.i.l.bf16 %v3138_v10 }
 0x247   : > { %v2508_v50 = vpack.c.bf16 %v3054_v5, %v3054_v5  ;;  %v2492_v28 = vpack.c.bf16 %v3051_v11, %v3051_v11 }
 0x248   : > { %v3055_v7 = vpop.trf.xlu0  ;;  %v2540_v6 = vpack.c.bf16 %v3142_v39, %v3142_v39  ;;  %v2524_v57 = vpack.c.bf16 %v3139_v46, %v3139_v46 }
 0x249   : > { %v3059_v49 = vunpack.i.h.bf16 %v3055_v7  ;;  %2370 = vst.msk [vmem:[%s4405_s13 + $0x68] sm:$0xf] %vm1518_vm0, %v2508_v50  ;;  %1529 = vst.msk [vmem:[%s4405_s13 + $0x28] sm:$0xf] %vm1518_vm0, %v2492_v28  ;;  %v3143_v41 = vpop.trf.xlu1  ;;  %v3056_v15 = vunpack.i.l.bf16 %v3055_v7 }
 0x24a   : > { %2434 = vst.msk [vmem:[%s4405_s13 + $0xe8] sm:$0xf] %vm1518_vm0, %v2540_v6  ;;  %2402 = vst.msk [vmem:[%s4405_s13 + $0xa8] sm:$0xf] %vm1518_vm0, %v2524_v57  ;;  %v3147_v58 = vunpack.i.h.bf16 %v3143_v41  ;;  %v3144_v8 = vunpack.i.l.bf16 %v3143_v41 }
 0x24b   : > { %v2509_v35 = vpack.c.bf16 %v3059_v49, %v3059_v49  ;;  %v2493_v43 = vpack.c.bf16 %v3056_v15, %v3056_v15 }
 0x24c   : > { %v3060_v32 = vpop.trf.xlu0  ;;  %v2541_v18 = vpack.c.bf16 %v3147_v58, %v3147_v58  ;;  %v2525_v26 = vpack.c.bf16 %v3144_v8, %v3144_v8 }
 0x24d   : > { %v3064_v36 = vunpack.i.h.bf16 %v3060_v32  ;;  %2371 = vst.msk [vmem:[%s4405_s13 + $0x6c] sm:$0xf] %vm1518_vm0, %v2509_v35  ;;  %1530 = vst.msk [vmem:[%s4405_s13 + $0x2c] sm:$0xf] %vm1518_vm0, %v2493_v43  ;;  %v3148_v27 = vpop.trf.xlu1  ;;  %v3061_v4 = vunpack.i.l.bf16 %v3060_v32 }
 0x24e   : > { %2435 = vst.msk [vmem:[%s4405_s13 + $0xec] sm:$0xf] %vm1518_vm0, %v2541_v18  ;;  %2403 = vst.msk [vmem:[%s4405_s13 + $0xac] sm:$0xf] %vm1518_vm0, %v2525_v26  ;;  %v3152_v2 = vunpack.i.h.bf16 %v3148_v27  ;;  %v3149_v63 = vunpack.i.l.bf16 %v3148_v27 }
 0x24f   : > { %v2510_v1 = vpack.c.bf16 %v3064_v36, %v3064_v36  ;;  %v2494_v38 = vpack.c.bf16 %v3061_v4, %v3061_v4 }
 0x250   : > { %v3065_v20 = vpop.trf.xlu0  ;;  %v2542_v34 = vpack.c.bf16 %v3152_v2, %v3152_v2  ;;  %v2526_v24 = vpack.c.bf16 %v3149_v63, %v3149_v63 }
 0x251   : > { %v3069_v0 = vunpack.i.h.bf16 %v3065_v20  ;;  %2372 = vst.msk [vmem:[%s4405_s13 + $0x70] sm:$0xf] %vm1518_vm0, %v2510_v1  ;;  %1531 = vst.msk [vmem:[%s4405_s13 + $0x30] sm:$0xf] %vm1518_vm0, %v2494_v38  ;;  %v3153_v52 = vpop.trf.xlu1  ;;  %v3066_v19 = vunpack.i.l.bf16 %v3065_v20 }
 0x252   : > { %2436 = vst.msk [vmem:[%s4405_s13 + $0xf0] sm:$0xf] %vm1518_vm0, %v2542_v34  ;;  %2404 = vst.msk [vmem:[%s4405_s13 + $0xb0] sm:$0xf] %vm1518_vm0, %v2526_v24  ;;  %v3157_v22 = vunpack.i.h.bf16 %v3153_v52  ;;  %v3154_v9 = vunpack.i.l.bf16 %v3153_v52 }
 0x253   : > { %v2511_v23 = vpack.c.bf16 %v3069_v0, %v3069_v0  ;;  %v2495_v12 = vpack.c.bf16 %v3066_v19, %v3066_v19 }
 0x254   : > { %v3070_v48 = vpop.trf.xlu0  ;;  %v2543_v53 = vpack.c.bf16 %v3157_v22, %v3157_v22  ;;  %v2527_v61 = vpack.c.bf16 %v3154_v9, %v3154_v9 }
 0x255   : > { %v3074_v51 = vunpack.i.h.bf16 %v3070_v48  ;;  %2373 = vst.msk [vmem:[%s4405_s13 + $0x74] sm:$0xf] %vm1518_vm0, %v2511_v23  ;;  %1532 = vst.msk [vmem:[%s4405_s13 + $0x34] sm:$0xf] %vm1518_vm0, %v2495_v12  ;;  %v3158_v44 = vpop.trf.xlu1  ;;  %v3071_v33 = vunpack.i.l.bf16 %v3070_v48 }
 0x256   : > { %2437 = vst.msk [vmem:[%s4405_s13 + $0xf4] sm:$0xf] %vm1518_vm0, %v2543_v53  ;;  %2405 = vst.msk [vmem:[%s4405_s13 + $0xb4] sm:$0xf] %vm1518_vm0, %v2527_v61  ;;  %v3162_v30 = vunpack.i.h.bf16 %v3158_v44  ;;  %v3159_v42 = vunpack.i.l.bf16 %v3158_v44 }
 0x257   : > { %v2512_v55 = vpack.c.bf16 %v3074_v51, %v3074_v51  ;;  %v2496_v37 = vpack.c.bf16 %v3071_v33, %v3071_v33 }
 0x258   : > { %v3075_v29 = vpop.trf.xlu0  ;;  %v2544_v31 = vpack.c.bf16 %v3162_v30, %v3162_v30  ;;  %v2528_v14 = vpack.c.bf16 %v3159_v42, %v3159_v42 }
 0x259   : > { %v3079_v60 = vunpack.i.h.bf16 %v3075_v29  ;;  %2374 = vst.msk [vmem:[%s4405_s13 + $0x78] sm:$0xf] %vm1518_vm0, %v2512_v55  ;;  %1533 = vst.msk [vmem:[%s4405_s13 + $0x38] sm:$0xf] %vm1518_vm0, %v2496_v37  ;;  %v3163_v25 = vpop.trf.xlu1  ;;  %v3076_v45 = vunpack.i.l.bf16 %v3075_v29 }
 0x25a   : > { %2438 = vst.msk [vmem:[%s4405_s13 + $0xf8] sm:$0xf] %vm1518_vm0, %v2544_v31  ;;  %2406 = vst.msk [vmem:[%s4405_s13 + $0xb8] sm:$0xf] %vm1518_vm0, %v2528_v14  ;;  %v3167_v56 = vunpack.i.h.bf16 %v3163_v25  ;;  %v3164_v62 = vunpack.i.l.bf16 %v3163_v25 }
 0x25b   : > { %v2513_v59 = vpack.c.bf16 %v3079_v60, %v3079_v60  ;;  %v2497_v54 = vpack.c.bf16 %v3076_v45, %v3076_v45 }
 0x25c   : > { %v2545_v16 = vpack.c.bf16 %v3167_v56, %v3167_v56  ;;  %v2529_v21 = vpack.c.bf16 %v3164_v62, %v3164_v62 }
 0x25d   : > { %2375 = vst.msk [vmem:[%s4405_s13 + $0x7c] sm:$0xf] %vm1518_vm0, %v2513_v59  ;;  %1534 = vst.msk [vmem:[%s4405_s13 + $0x3c] sm:$0xf] %vm1518_vm0, %v2497_v54 }
 0x25e   : > { %2439 = vst.msk [vmem:[%s4405_s13 + $0xfc] sm:$0xf] %vm1518_vm0, %v2545_v16  ;;  %2407 = vst.msk [vmem:[%s4405_s13 + $0xbc] sm:$0xf] %vm1518_vm0, %v2529_v21 }
 0x25f PF: > { %p2933_p8 = scmp.ge.s32.totalorder %s3366_s10, 2  ;;  %s2111_s15 = sand.u32 1, %s3346_s27  }
 0x260   : > { %p4791_p6 = scmp.ne.s32.totalorder %s4598_s17, 0  ;;  %s2112_s18 = scalar_lea.sflag [#allocation4], %s2111_s15 }
 0x262   : > { %p2923_p7 = pnand %p2933_p8, %p4791_p6 }
 0x264   : > { %3337 = dma.done.wait (!%p2923_p7), %s2112_s18, 1024  }
 0x265   : > { %3339 = vsyncadd (!%p2923_p7), %s2112_s18, 4294966272  ;;  %s2121_s29 = scalar_lea.sflag [#allocation9], %s2111_s15 }
 0x266   : > { %3341 = dma.done.wait (!%p2923_p7), %s2121_s29, 1024  }
 0x267   : > { %3343 = vsyncadd (!%p2923_p7), %s2121_s29, 4294966272  ;;  %s27_s10 = sadd.s32 1, %s3366_s10   ;;  %s4792_s23 = sld [smem:[#allocation14_spill]] }
 0x268   : > { %p24_p9 = scmp.ge.s32.totalorder %s27_s10, 4   ;;  %s4793_s29 = sld [smem:[#allocation17_spill]] }
 0x269   : > { %s4794_s30 = sld [smem:[#allocation15_spill]]  ;;  %s4795_s9 = sld [smem:[#allocation16_spill]] }
 0x26a   : > { %s4796_s27 = smov %s3350_s28  ;;  %26 = sbr.rel (!%p24_p9) target bundleno = 10 (0xa), region = 127 }
 0x26d   : > { %s4797_s28 = smov %s4792_s23 }
 0x271   :  { %2126 = vsyncpa [#allocation3], 1 }
 0x272   :  { %2128 = vsyncpa [#allocation3 + $0x1], 1 }
 0x273   :  { %2129 = vsyncpa [#allocation6], 1 }
 0x274   :  { %2130 = vsyncpa [#allocation4], 1 }
 0x275   :  { %2132 = vsyncpa [#allocation4 + $0x1], 1 }
 0x276   :  { %2133 = vsyncpa [#allocation9], 1 }
 0x277   :  { %2135 = vsyncpa [#allocation9 + $0x1], 1 }

</bundles_post_ra>
